<compile_context>
chip_gen: v5e
topology: v5e:2x2
jax: 0.10.0
libtpu: 0.0.40
codegen_flags: <defaults>
</compile_context>

<pallas_src>
import functools
import math

import jax
import jax.numpy as jnp
from jax.experimental import pallas as pl
from jax.experimental.pallas import tpu as pltpu


# --------------------------------- fused kernel ---------------------------------
def _fused_dscaspp_kernel(x_ref, xh_ref, wpw_ref, wdw_ref, shift_ref, o_ref, y_ref,
                          *, K, dil, halo, Wout, neg_slope):
    # x_ref:     (1, th,   Wp, Cin)   main row slab of the zero-padded input
    # xh_ref:    (1, halo, Wp, Cin)   halo rows just below the main slab (alias of x_ref if K==1)
    # wpw_ref:   (Cin, Cout)          1x1 conv weight
    # wdw_ref:   (K*K, Cout)          depthwise weights, BN scale already folded in
    # shift_ref: (1, Cout)            folded BN shift
    # o_ref:     (1, th, Wout, Cout)
    # y_ref:     (th + halo, Wp, Cout) f32 VMEM scratch holding the pointwise result
    th = x_ref.shape[1]
    Wp = x_ref.shape[2]
    Cin = x_ref.shape[3]
    Cout = o_ref.shape[3]

    # ---- 1x1 pointwise conv on the MXU; result stays resident in VMEM ----
    # Wp % 8 == 0 (guaranteed by the wrapper), so these reshapes are layout-preserving.
    xm = x_ref[0].reshape(th * Wp, Cin)
    y_ref[0:th] = jnp.dot(
        xm, wpw_ref[...], preferred_element_type=jnp.float32
    ).reshape(th, Wp, Cout)
    if halo > 0:
        xh = xh_ref[0].reshape(halo * Wp, Cin)
        y_ref[th:th + halo] = jnp.dot(
            xh, wpw_ref[...], preferred_element_type=jnp.float32
        ).reshape(halo, Wp, Cout)

    # ---- dilated depthwise conv (BN scale folded into wdw) ----
    acc = None
    for kw in range(K):                      # static tap loop, K is small (e.g. 3)
        # one sublane-offset W slice per kw; the kh slices below are free H offsets
        ykw = y_ref[:, kw * dil: kw * dil + Wout, :]
        for kh in range(K):
            tap = ykw[kh * dil: kh * dil + th] * wdw_ref[kh * K + kw]
            acc = tap if acc is None else acc + tap

    # ---- folded-BN shift + LeakyReLU (negative_slope = 0.01, PyTorch default) ----
    z = acc + shift_ref[0]
    o_ref[0] = jnp.where(z > 0, z, neg_slope * z).astype(o_ref.dtype)


def _pick_row_tile(Hout, halo, Wp, Wout, Cin, Cout, budget_bytes=6 << 20):
    """Largest H-row tile (multiple of the halo) whose per-step VMEM footprint fits."""
    step = halo if halo > 0 else 8
    cap = pl.cdiv(Hout, step) * step
    best = step
    t = step
    while t <= cap:
        per_step = 4 * (2 * t * Wp * Cin                # main input slab, double-buffered
                        + 2 * max(halo, 1) * Wp * Cin   # halo slab, double-buffered
                        + 2 * t * Wout * Cout           # output slab, double-buffered
                        + (t + halo) * Wp * Cout)       # f32 pointwise scratch
        if per_step > budget_bytes:
            break
        best = t
        t += step
    return best


# --------------------------------- module wrapper ---------------------------------
def ds_caspp_forward(x_nchw, params, *, padding, dilation, row_tile=None):
    N, Cin, H, W = x_nchw.shape
    w_pw = params["w_pw"].astype(jnp.float32)        # (Cin, Cout)
    w_dw = params["w_dw"].astype(jnp.float32)        # (K, K, Cout)
    scale = params["bn_scale"].astype(jnp.float32)   # (Cout,)
    shift = params["bn_shift"].astype(jnp.float32)   # (Cout,)
    K = w_dw.shape[0]
    Cout = w_pw.shape[1]

    halo = dilation * (K - 1)
    Hout = H + 2 * padding - halo
    Wout = W + 2 * padding - halo
    assert Hout > 0 and Wout > 0

    # Fold eval-mode BN scale into the depthwise weights; only the shift stays in-kernel.
    w_dw_s = (w_dw * scale[None, None, :]).reshape(K * K, Cout)
    shift2 = shift.reshape(1, Cout)

    # Row-tile: a multiple of the halo so the halo side-stream uses plain blocked indexing.
    step = halo if halo > 0 else 8
    Wp = pl.cdiv(W + 2 * padding, 8) * 8             # pad W to a multiple of 8 (free reshapes)
    if row_tile is None:
        th = _pick_row_tile(Hout, halo, Wp, Wout, Cin, Cout)
    else:
        th = max(step, (row_tile // step) * step)
    nt = pl.cdiv(Hout, th)

    # NCHW -> NHWC and zero-pad: conv padding plus extra zero rows/cols so every input block
    # is fully in-bounds (H padded to nt*th + halo).  Extra zeros are never tapped for valid
    # output positions, and the 1x1 conv of zero rows is zero (no bias), so this is exactly
    # equivalent to padding the pointwise output.
    x = jnp.transpose(x_nchw, (0, 2, 3, 1)).astype(jnp.float32)
    Hp = nt * th + halo
    xp = jnp.pad(x, ((0, 0),
                     (padding, Hp - H - padding),
                     (padding, Wp - W - padding),
                     (0, 0)))

    body = functools.partial(
        _fused_dscaspp_kernel, K=K, dil=dilation, halo=halo, Wout=Wout, neg_slope=0.01)

    main_spec = pl.BlockSpec((1, th, Wp, Cin), lambda n, i: (n, i, 0, 0))
    weight_specs = [
        pl.BlockSpec((Cin, Cout), lambda n, i: (0, 0)),
        pl.BlockSpec((K * K, Cout), lambda n, i: (0, 0)),
        pl.BlockSpec((1, Cout), lambda n, i: (0, 0)),
    ]
    if halo > 0:
        r = th // halo
        halo_spec = pl.BlockSpec((1, halo, Wp, Cin), lambda n, i: (n, (i + 1) * r, 0, 0))
        in_specs = [main_spec, halo_spec] + weight_specs
        args = (xp, xp, w_pw, w_dw_s, shift2)
        kernel = body
    else:
        # K == 1: no halo rows needed -> do not stream a second input block at all.
        in_specs = [main_spec] + weight_specs
        args = (xp, w_pw, w_dw_s, shift2)

        def kernel(x_ref, wpw_ref, wdw_ref, shift_ref, o_ref, y_ref):
            body(x_ref, x_ref, wpw_ref, wdw_ref, shift_ref, o_ref, y_ref)

    flops = 2 * N * Hp * Wp * Cin * Cout + (2 * K * K + 4) * N * Hout * Wout * Cout
    bytes_accessed = 4 * (N * Hp * Wp * Cin                      # main input stream
                          + N * nt * halo * Wp * Cin             # halo stream
                          + N * Hout * Wout * Cout               # output
                          + Cin * Cout + K * K * Cout + Cout)    # weights

    out = pl.pallas_call(
        kernel,
        out_shape=jax.ShapeDtypeStruct((N, Hout, Wout, Cout), jnp.float32),
        grid_spec=pltpu.PrefetchScalarGridSpec(
            num_scalar_prefetch=0,
            grid=(N, nt),
            in_specs=in_specs,
            out_specs=pl.BlockSpec((1, th, Wout, Cout), lambda n, i: (n, i, 0, 0)),
            scratch_shapes=[pltpu.VMEM((th + halo, Wp, Cout), jnp.float32)],
        ),
        compiler_params=pltpu.CompilerParams(
            dimension_semantics=("parallel", "parallel"),
            vmem_limit_bytes=48 * 1024 * 1024,
        ),
        cost_estimate=pl.CostEstimate(
            flops=int(flops), transcendentals=0, bytes_accessed=int(bytes_accessed)),
    )(*args)

    return jnp.transpose(out, (0, 3, 1, 2))   # NHWC -> NCHW


# ----------------------------------- parameters -----------------------------------
def init_params(key, inplanes, planes, kernel_size):
    k_pw, k_dw = jax.random.split(key)
    # kaiming_normal_ (fan_in, gain=sqrt(2)) as in the PyTorch _init_weight
    std_pw = math.sqrt(2.0 / (inplanes * 1 * 1))
    w_pw = std_pw * jax.random.normal(k_pw, (inplanes, planes), jnp.float32)
    std_dw = math.sqrt(2.0 / (1 * kernel_size * kernel_size))   # groups=planes -> fan_in = k*k
    w_dw = std_dw * jax.random.normal(k_dw, (kernel_size, kernel_size, planes), jnp.float32)
    # eval-mode BatchNorm: gamma=1, beta=0, running_mean=0, running_var=1
    eps = 1e-5
    gamma = jnp.ones((planes,), jnp.float32)
    beta = jnp.zeros((planes,), jnp.float32)
    mean = jnp.zeros((planes,), jnp.float32)
    var = jnp.ones((planes,), jnp.float32)
    scale = gamma / jnp.sqrt(var + eps)
    shift = beta - mean * scale
    return {"w_pw": w_pw, "w_dw": w_dw, "bn_scale": scale, "bn_shift": shift}


# ------------------------------------ reference ------------------------------------
def ref_forward(x_nchw, params, *, padding, dilation):
    x = jnp.transpose(x_nchw, (0, 2, 3, 1)).astype(jnp.float32)
    y = jnp.einsum("nhwc,cd->nhwd", x, params["w_pw"])
    K = params["w_dw"].shape[0]
    N, H, W, C = y.shape
    yp = jnp.pad(y, ((0, 0), (padding, padding), (padding, padding), (0, 0)))
    Hout = H + 2 * padding - dilation * (K - 1)
    Wout = W + 2 * padding - dilation * (K - 1)
    acc = jnp.zeros((N, Hout, Wout, C), jnp.float32)
    for kh in range(K):
        for kw in range(K):
            tap = yp[:, kh * dilation:kh * dilation + Hout,
                     kw * dilation:kw * dilation + Wout, :]
            acc = acc + tap * params["w_dw"][kh, kw, :]
    z = acc * params["bn_scale"] + params["bn_shift"]
    z = jnp.where(z > 0, z, 0.01 * z)
    return jnp.transpose(z, (0, 3, 1, 2))


if __name__ == "__main__":
    N, inplanes, planes = 2, 4, 8
    H = W = 16
    kernel_size, dilation = 3, 2
    padding = dilation   # "same" spatial size, as in ASPP branches

    key = jax.random.PRNGKey(0)
    k_x, k_p, k_x2 = jax.random.split(key, 3)
    x = jax.random.normal(k_x, (N, inplanes, H, W), jnp.float32)
    params = init_params(k_p, inplanes, planes, kernel_size)

    out = jax.block_until_ready(
        ds_caspp_forward(x, params, padding=padding, dilation=dilation))
    ref = jax.block_until_ready(
        ref_forward(x, params, padding=padding, dilation=dilation))
    assert out.shape == (N, planes, H, W), out.shape
    assert float(jnp.max(jnp.abs(out - ref))) < 1e-3

    # second shape: ragged H (non-divisible last row tile) + forced multi-tile row pipeline
    H2, W2 = 20, 12
    x2 = jax.random.normal(k_x2, (N, inplanes, H2, W2), jnp.float32)
    out2 = jax.block_until_ready(
        ds_caspp_forward(x2, params, padding=padding, dilation=dilation, row_tile=8))
    ref2 = jax.block_until_ready(
        ref_forward(x2, params, padding=padding, dilation=dilation))
    assert out2.shape == (N, planes, H2, W2), out2.shape
    assert float(jnp.max(jnp.abs(out2 - ref2))) < 1e-3

    print("KERNEL_OK")
</pallas_src>

<mosaic_0001>
module attributes {stable_mosaic.version = 11 : i64} {
  func.func @_fused_dscaspp_kernel(%arg0: i32, %arg1: i32, %arg2: memref<1x16x24x4xf32, #tpu.memory_space<vmem>>, %arg3: memref<1x4x24x4xf32, #tpu.memory_space<vmem>>, %arg4: memref<4x8xf32, #tpu.memory_space<vmem>>, %arg5: memref<9x8xf32, #tpu.memory_space<vmem>>, %arg6: memref<1x8xf32, #tpu.memory_space<vmem>>, %arg7: memref<1x16x16x8xf32, #tpu.memory_space<vmem>>, %arg8: memref<20x24x8xf32, #tpu.memory_space<vmem>>) attributes {dimension_semantics = [#tpu.dimension_semantics<parallel>, #tpu.dimension_semantics<parallel>], iteration_bounds = array<i64: 2, 1>, scalar_prefetch = 0 : i64, scratch_operands = 1 : i64, tpu.core_type = #tpu.core_type<tc>, window_params = [{transform_indices = @transform_0, window_bounds = array<i64: 1, 16, 24, 4>}, {transform_indices = @transform_1, window_bounds = array<i64: 1, 4, 24, 4>}, {pipeline_mode = #tpu.pipeline_mode<synchronous>, transform_indices = @transform_2, window_bounds = array<i64: 4, 8>}, {pipeline_mode = #tpu.pipeline_mode<synchronous>, transform_indices = @transform_3, window_bounds = array<i64: 9, 8>}, {pipeline_mode = #tpu.pipeline_mode<synchronous>, transform_indices = @transform_4, window_bounds = array<i64: 1, 8>}, {transform_indices = @transform_5, window_bounds = array<i64: 1, 16, 16, 8>}]} {
    %c0 = arith.constant 0 : index
    %c0_0 = arith.constant 0 : index
    %c0_1 = arith.constant 0 : index
    %c0_2 = arith.constant 0 : index
    %0 = vector.load %arg2[%c0, %c0_0, %c0_1, %c0_2] : memref<1x16x24x4xf32, #tpu.memory_space<vmem>>, vector<1x16x24x4xf32>
    %1 = vector.shape_cast %0 : vector<1x16x24x4xf32> to vector<16x24x4xf32>
    %2 = vector.shape_cast %1 : vector<16x24x4xf32> to vector<384x4xf32>
    %c0_3 = arith.constant 0 : index
    %c0_4 = arith.constant 0 : index
    %3 = vector.load %arg4[%c0_3, %c0_4] : memref<4x8xf32, #tpu.memory_space<vmem>>, vector<4x8xf32>
    %cst = arith.constant dense<0.000000e+00> : vector<384x8xf32>
    %4 = tpu.matmul %2, %3, %cst {dimension_numbers = #tpu.dot_dimension_numbers<[1], [0], [0], [1], [0, 0, 1, 1], [], []>} : vector<384x4xf32>, vector<4x8xf32>, vector<384x8xf32> -> vector<384x8xf32>
    %5 = vector.shape_cast %4 : vector<384x8xf32> to vector<16x24x8xf32>
    %c0_5 = arith.constant 0 : index
    %c0_6 = arith.constant 0 : index
    %c0_7 = arith.constant 0 : index
    %6 = vector.load %arg8[%c0_5, %c0_6, %c0_7] : memref<20x24x8xf32, #tpu.memory_space<vmem>>, vector<16x24x8xf32>
    tpu.vector_store %arg8[%c0_5, %c0_6, %c0_7], %5 {strides = array<i32>} : memref<20x24x8xf32, #tpu.memory_space<vmem>>, vector<16x24x8xf32>,
    %c0_8 = arith.constant 0 : index
    %c0_9 = arith.constant 0 : index
    %c0_10 = arith.constant 0 : index
    %c0_11 = arith.constant 0 : index
    %7 = vector.load %arg3[%c0_8, %c0_9, %c0_10, %c0_11] : memref<1x4x24x4xf32, #tpu.memory_space<vmem>>, vector<1x4x24x4xf32>
    %8 = vector.shape_cast %7 : vector<1x4x24x4xf32> to vector<4x24x4xf32>
    %9 = vector.shape_cast %8 : vector<4x24x4xf32> to vector<96x4xf32>
    %c0_12 = arith.constant 0 : index
    %c0_13 = arith.constant 0 : index
    %10 = vector.load %arg4[%c0_12, %c0_13] : memref<4x8xf32, #tpu.memory_space<vmem>>, vector<4x8xf32>
    %cst_14 = arith.constant dense<0.000000e+00> : vector<96x8xf32>
    %11 = tpu.matmul %9, %10, %cst_14 {dimension_numbers = #tpu.dot_dimension_numbers<[1], [0], [0], [1], [0, 0, 1, 1], [], []>} : vector<96x4xf32>, vector<4x8xf32>, vector<96x8xf32> -> vector<96x8xf32>
    %12 = vector.shape_cast %11 : vector<96x8xf32> to vector<4x24x8xf32>
    %c16 = arith.constant 16 : index
    %c0_15 = arith.constant 0 : index
    %c0_16 = arith.constant 0 : index
    %13 = vector.load %arg8[%c16, %c0_15, %c0_16] : memref<20x24x8xf32, #tpu.memory_space<vmem>>, vector<4x24x8xf32>
    tpu.vector_store %arg8[%c16, %c0_15, %c0_16], %12 {strides = array<i32>} : memref<20x24x8xf32, #tpu.memory_space<vmem>>, vector<4x24x8xf32>,
    %c0_17 = arith.constant 0 : index
    %c0_18 = arith.constant 0 : index
    %c0_19 = arith.constant 0 : index
    %14 = vector.load %arg8[%c0_17, %c0_18, %c0_19] : memref<20x24x8xf32, #tpu.memory_space<vmem>>, vector<20x16x8xf32>
    %15 = vector.extract_strided_slice %14 {offsets = [0, 0, 0], sizes = [16, 16, 8], strides = [1, 1, 1]} : vector<20x16x8xf32> to vector<16x16x8xf32>
    %c0_20 = arith.constant 0 : index
    %c0_21 = arith.constant 0 : index
    %16 = vector.load %arg5[%c0_20, %c0_21] : memref<9x8xf32, #tpu.memory_space<vmem>>, vector<1x8xf32>
    %17 = vector.shape_cast %16 : vector<1x8xf32> to vector<8xf32>
    %18 = vector.shape_cast %17 : vector<8xf32> to vector<1x1x8xf32>
    %19 = vector.broadcast %18 : vector<1x1x8xf32> to vector<16x16x8xf32>
    %20 = arith.mulf %15, %19 : vector<16x16x8xf32>
    %21 = vector.extract_strided_slice %14 {offsets = [2, 0, 0], sizes = [16, 16, 8], strides = [1, 1, 1]} : vector<20x16x8xf32> to vector<16x16x8xf32>
    %c3 = arith.constant 3 : index
    %c0_22 = arith.constant 0 : index
    %22 = vector.load %arg5[%c3, %c0_22] : memref<9x8xf32, #tpu.memory_space<vmem>>, vector<1x8xf32>
    %23 = vector.shape_cast %22 : vector<1x8xf32> to vector<8xf32>
    %24 = vector.shape_cast %23 : vector<8xf32> to vector<1x1x8xf32>
    %25 = vector.broadcast %24 : vector<1x1x8xf32> to vector<16x16x8xf32>
    %26 = arith.mulf %21, %25 : vector<16x16x8xf32>
    %27 = arith.addf %20, %26 : vector<16x16x8xf32>
    %28 = vector.extract_strided_slice %14 {offsets = [4, 0, 0], sizes = [16, 16, 8], strides = [1, 1, 1]} : vector<20x16x8xf32> to vector<16x16x8xf32>
    %c6 = arith.constant 6 : index
    %c0_23 = arith.constant 0 : index
    %29 = vector.load %arg5[%c6, %c0_23] : memref<9x8xf32, #tpu.memory_space<vmem>>, vector<1x8xf32>
    %30 = vector.shape_cast %29 : vector<1x8xf32> to vector<8xf32>
    %31 = vector.shape_cast %30 : vector<8xf32> to vector<1x1x8xf32>
    %32 = vector.broadcast %31 : vector<1x1x8xf32> to vector<16x16x8xf32>
    %33 = arith.mulf %28, %32 : vector<16x16x8xf32>
    %34 = arith.addf %27, %33 : vector<16x16x8xf32>
    %c0_24 = arith.constant 0 : index
    %c2 = arith.constant 2 : index
    %c0_25 = arith.constant 0 : index
    %35 = vector.load %arg8[%c0_24, %c2, %c0_25] : memref<20x24x8xf32, #tpu.memory_space<vmem>>, vector<20x16x8xf32>
    %36 = vector.extract_strided_slice %35 {offsets = [0, 0, 0], sizes = [16, 16, 8], strides = [1, 1, 1]} : vector<20x16x8xf32> to vector<16x16x8xf32>
    %c1 = arith.constant 1 : index
    %c0_26 = arith.constant 0 : index
    %37 = vector.load %arg5[%c1, %c0_26] : memref<9x8xf32, #tpu.memory_space<vmem>>, vector<1x8xf32>
    %38 = vector.shape_cast %37 : vector<1x8xf32> to vector<8xf32>
    %39 = vector.shape_cast %38 : vector<8xf32> to vector<1x1x8xf32>
    %40 = vector.broadcast %39 : vector<1x1x8xf32> to vector<16x16x8xf32>
    %41 = arith.mulf %36, %40 : vector<16x16x8xf32>
    %42 = arith.addf %34, %41 : vector<16x16x8xf32>
    %43 = vector.extract_strided_slice %35 {offsets = [2, 0, 0], sizes = [16, 16, 8], strides = [1, 1, 1]} : vector<20x16x8xf32> to vector<16x16x8xf32>
    %c4 = arith.constant 4 : index
    %c0_27 = arith.constant 0 : index
    %44 = vector.load %arg5[%c4, %c0_27] : memref<9x8xf32, #tpu.memory_space<vmem>>, vector<1x8xf32>
    %45 = vector.shape_cast %44 : vector<1x8xf32> to vector<8xf32>
    %46 = vector.shape_cast %45 : vector<8xf32> to vector<1x1x8xf32>
    %47 = vector.broadcast %46 : vector<1x1x8xf32> to vector<16x16x8xf32>
    %48 = arith.mulf %43, %47 : vector<16x16x8xf32>
    %49 = arith.addf %42, %48 : vector<16x16x8xf32>
    %50 = vector.extract_strided_slice %35 {offsets = [4, 0, 0], sizes = [16, 16, 8], strides = [1, 1, 1]} : vector<20x16x8xf32> to vector<16x16x8xf32>
    %c7 = arith.constant 7 : index
    %c0_28 = arith.constant 0 : index
    %51 = vector.load %arg5[%c7, %c0_28] : memref<9x8xf32, #tpu.memory_space<vmem>>, vector<1x8xf32>
    %52 = vector.shape_cast %51 : vector<1x8xf32> to vector<8xf32>
    %53 = vector.shape_cast %52 : vector<8xf32> to vector<1x1x8xf32>
    %54 = vector.broadcast %53 : vector<1x1x8xf32> to vector<16x16x8xf32>
    %55 = arith.mulf %50, %54 : vector<16x16x8xf32>
    %56 = arith.addf %49, %55 : vector<16x16x8xf32>
    %c0_29 = arith.constant 0 : index
    %c4_30 = arith.constant 4 : index
    %c0_31 = arith.constant 0 : index
    %57 = vector.load %arg8[%c0_29, %c4_30, %c0_31] : memref<20x24x8xf32, #tpu.memory_space<vmem>>, vector<20x16x8xf32>
    %58 = vector.extract_strided_slice %57 {offsets = [0, 0, 0], sizes = [16, 16, 8], strides = [1, 1, 1]} : vector<20x16x8xf32> to vector<16x16x8xf32>
    %c2_32 = arith.constant 2 : index
    %c0_33 = arith.constant 0 : index
    %59 = vector.load %arg5[%c2_32, %c0_33] : memref<9x8xf32, #tpu.memory_space<vmem>>, vector<1x8xf32>
    %60 = vector.shape_cast %59 : vector<1x8xf32> to vector<8xf32>
    %61 = vector.shape_cast %60 : vector<8xf32> to vector<1x1x8xf32>
    %62 = vector.broadcast %61 : vector<1x1x8xf32> to vector<16x16x8xf32>
    %63 = arith.mulf %58, %62 : vector<16x16x8xf32>
    %64 = arith.addf %56, %63 : vector<16x16x8xf32>
    %65 = vector.extract_strided_slice %57 {offsets = [2, 0, 0], sizes = [16, 16, 8], strides = [1, 1, 1]} : vector<20x16x8xf32> to vector<16x16x8xf32>
    %c5 = arith.constant 5 : index
    %c0_34 = arith.constant 0 : index
    %66 = vector.load %arg5[%c5, %c0_34] : memref<9x8xf32, #tpu.memory_space<vmem>>, vector<1x8xf32>
    %67 = vector.shape_cast %66 : vector<1x8xf32> to vector<8xf32>
    %68 = vector.shape_cast %67 : vector<8xf32> to vector<1x1x8xf32>
    %69 = vector.broadcast %68 : vector<1x1x8xf32> to vector<16x16x8xf32>
    %70 = arith.mulf %65, %69 : vector<16x16x8xf32>
    %71 = arith.addf %64, %70 : vector<16x16x8xf32>
    %72 = vector.extract_strided_slice %57 {offsets = [4, 0, 0], sizes = [16, 16, 8], strides = [1, 1, 1]} : vector<20x16x8xf32> to vector<16x16x8xf32>
    %c8 = arith.constant 8 : index
    %c0_35 = arith.constant 0 : index
    %73 = vector.load %arg5[%c8, %c0_35] : memref<9x8xf32, #tpu.memory_space<vmem>>, vector<1x8xf32>
    %74 = vector.shape_cast %73 : vector<1x8xf32> to vector<8xf32>
    %75 = vector.shape_cast %74 : vector<8xf32> to vector<1x1x8xf32>
    %76 = vector.broadcast %75 : vector<1x1x8xf32> to vector<16x16x8xf32>
    %77 = arith.mulf %72, %76 : vector<16x16x8xf32>
    %78 = arith.addf %71, %77 : vector<16x16x8xf32>
    %c0_36 = arith.constant 0 : index
    %c0_37 = arith.constant 0 : index
    %79 = vector.load %arg6[%c0_36, %c0_37] : memref<1x8xf32, #tpu.memory_space<vmem>>, vector<1x8xf32>
    %80 = vector.shape_cast %79 : vector<1x8xf32> to vector<8xf32>
    %81 = vector.shape_cast %80 : vector<8xf32> to vector<1x1x8xf32>
    %82 = vector.broadcast %81 : vector<1x1x8xf32> to vector<16x16x8xf32>
    %83 = arith.addf %78, %82 : vector<16x16x8xf32>
    %cst_38 = arith.constant 0.000000e+00 : f32
    %84 = vector.broadcast %cst_38 : f32 to vector<16x16x8xf32>
    %85 = arith.cmpf ogt, %83, %84 : vector<16x16x8xf32>
    %cst_39 = arith.constant 0.00999999977 : f32
    %86 = vector.broadcast %cst_39 : f32 to vector<16x16x8xf32>
    %87 = arith.mulf %86, %83 : vector<16x16x8xf32>
    %88 = arith.select %85, %83, %87 : vector<16x16x8xi1>, vector<16x16x8xf32>
    %c0_40 = arith.constant 0 : index
    %c0_41 = arith.constant 0 : index
    %c0_42 = arith.constant 0 : index
    %c0_43 = arith.constant 0 : index
    %89 = vector.load %arg7[%c0_40, %c0_41, %c0_42, %c0_43] : memref<1x16x16x8xf32, #tpu.memory_space<vmem>>, vector<1x16x16x8xf32>
    %90 = vector.shape_cast %89 : vector<1x16x16x8xf32> to vector<16x16x8xf32>
    %91 = vector.shape_cast %88 : vector<16x16x8xf32> to vector<1x16x16x8xf32>
    tpu.vector_store %arg7[%c0_40, %c0_41, %c0_42, %c0_43], %91 {strides = array<i32>} : memref<1x16x16x8xf32, #tpu.memory_space<vmem>>, vector<1x16x16x8xf32>,
    return
  }
  func.func @transform_0(%arg0: i32, %arg1: i32) -> (i32, i32, i32, i32) {
    %c0_i32 = arith.constant 0 : i32
    %c0_i32_0 = arith.constant 0 : i32
    %c0_i32_1 = arith.constant 0 : i32
    return %arg0, %arg1, %c0_i32, %c0_i32_0 : i32, i32, i32, i32
  }
  func.func @transform_1(%arg0: i32, %arg1: i32) -> (i32, i32, i32, i32) {
    %c1_i32 = arith.constant 1 : i32
    %0 = arith.addi %arg1, %c1_i32 : i32
    %c4_i32 = arith.constant 4 : i32
    %1 = arith.muli %0, %c4_i32 : i32
    %c0_i32 = arith.constant 0 : i32
    %c0_i32_0 = arith.constant 0 : i32
    %c0_i32_1 = arith.constant 0 : i32
    return %arg0, %1, %c0_i32, %c0_i32_0 : i32, i32, i32, i32
  }
  func.func @transform_2(%arg0: i32, %arg1: i32) -> (i32, i32) {
    %c0_i32 = arith.constant 0 : i32
    %c0_i32_0 = arith.constant 0 : i32
    %c0_i32_1 = arith.constant 0 : i32
    return %c0_i32, %c0_i32_0 : i32, i32
  }
  func.func @transform_3(%arg0: i32, %arg1: i32) -> (i32, i32) {
    %c0_i32 = arith.constant 0 : i32
    %c0_i32_0 = arith.constant 0 : i32
    %c0_i32_1 = arith.constant 0 : i32
    return %c0_i32, %c0_i32_0 : i32, i32
  }
  func.func @transform_4(%arg0: i32, %arg1: i32) -> (i32, i32) {
    %c0_i32 = arith.constant 0 : i32
    %c0_i32_0 = arith.constant 0 : i32
    %c0_i32_1 = arith.constant 0 : i32
    return %c0_i32, %c0_i32_0 : i32, i32
  }
  func.func @transform_5(%arg0: i32, %arg1: i32) -> (i32, i32, i32, i32) {
    %c0_i32 = arith.constant 0 : i32
    %c0_i32_0 = arith.constant 0 : i32
    %c0_i32_1 = arith.constant 0 : i32
    return %arg0, %arg1, %c0_i32, %c0_i32_0 : i32, i32, i32, i32
  }
}

</mosaic_0001>

<bundles_post_ra>
// kernel: tpu_custom_call.1
= control target key start
LH: loop header
LB: loop body
LE: loop exit
PB: predicated region body
PF: predicated region fallthrough
CT: control target
= control target key end

     0   :  { %s2017_s18 = smov 0   ;;  %s2019_s19 = smov 0   ;;  %s3360_s0 = inlined_call_operand.vmem [shape: f32[2,20,24,4], index: 0, kind: input, shape index: {}]   ;;  %s3361_s1 = inlined_call_operand.vmem [shape: f32[2,20,24,4], index: 1, kind: input, shape index: {}]   ;;  %s3362_s2 = inlined_call_operand.vmem [shape: f32[4,8], index: 2, kind: input, shape index: {}]   ;;  %s3363_s3 = inlined_call_operand.vmem [shape: f32[9,8], index: 3, kind: input, shape index: {}]   ;;  %s3364_s4 = inlined_call_operand.vmem [shape: f32[1,8], index: 4, kind: input, shape index: {}]   ;;  %s3365_s5 = inlined_call_operand.vmem [shape: f32[2,16,16,8], index: 5, kind: output, shape index: {}]  }
   0x1   :  { %s2021_s20 = smov 0  }
   0x2 LB: > { %s27_s21 = sadd.s32 1, %s1981_s19  ;;  %p1840_p0 = scmp.ge.s32.totalorder %s1985_s20, 1  ;;  %s1985_s20 = sphi %s2021_s20, %s15_s20   ;;  %s1981_s19 = sphi %s2019_s19, %s3623_s19   ;;  %s1977_s18 = sphi %s2017_s18, %s3622_s18  }
   0x3   : > { %p29_p1 = scmp.ge.s32.totalorder %s27_s21, 2  ;;  %p245_p2 = scmp.lt.s32.totalorder %s1985_s20, 3 }
   0x5   : > { %s3625_s21 = smov (%p29_p1, %s27_s21), 0  ;;  %p246_p3 = pnand %p1840_p0, %p245_p2 }
   0x7   : > { %249 = sbr.rel (%p246_p3) target bundleno = 450 (0x1c2), region = 40 }
   0xc   : > { %v395_v0 = vld [vmem:[%s3362_s2] sm:$0xf]  ;;  %vm541_vm0 = vcmask 1043456   ;;  %p306_p4 = scmp.lt.s32.totalorder %s1977_s18, 1  ;;  %vm396_vm1 = vcmask 31744   ;;  %vm706_vm2 = vcmask 64512  }
   0xd   : > { %1845 = vmatpush.msk.msra.mxu0 %vm541_vm0, %v395_v0  ;;  %1913 = vmatpush.msk.msra.mxu2 %vm541_vm0, %v395_v0  ;;  %v767_v1 = vld [vmem:[%s3362_s2] sm:$0xf] }
   0xe   : > { %1914 = vmatpush.msk.msra.mxu3 %vm541_vm0, %v395_v0  ;;  %s3627_s18 = smov (!%p306_p4, %s1977_s18), 1  ;;  %1912 = vmatpush.msk.msra.mxu1 %vm541_vm0, %v395_v0 }
   0xf   : > { %s1915_s26 = smul.u32 480, %s3627_s18 }
  0x10   : > { %1894 = vmatpush.msk.msrb.mxu1 %vm541_vm0, %v767_v1 }
  0x11   : > { %s2047_s29 = scalar_lea.vmem %s3360_s0, %s1915_s26  ;;  %s1910_s30 = sadd.s32 384, %s1915_s26 }
  0x12   : > { %v347_v2 = vld [vmem:[%s2047_s29] sm:$0xff]  ;;  %v365_v3 = vld [vmem:[%s2047_s29 + $0x90] sm:$0xff]  ;;  %v380_v4 = vld [vmem:[%s2047_s29 + $0x108] sm:$0xff]  ;;  %s2076_s8 = scalar_lea.vmem %s3361_s1, %s1910_s30 }
  0x13   : > { %1846 = vmatmul.msk.f32.vlgmr.msra.gmra.mxu0 %vm396_vm1, %v347_v2  ;;  %1864 = vmatmul.msk.f32.vlgmr.msra.gmra.mxu2 %vm396_vm1, %v365_v3  ;;  %v362_v5 = vld [vmem:[%s2047_s29 + $0x78] sm:$0xff]  ;;  %v348_v6 = vld [vmem:[%s2047_s29 + $0x8] sm:$0xff]  ;;  %v381_v8 = vld [vmem:[%s2047_s29 + $0x110] sm:$0xff] }
  0x14   : > { %1879 = vmatmul.msk.f32.vlgmr.msra.gmra.mxu3 %vm396_vm1, %v380_v4  ;;  %1861 = vmatmul.msk.f32.vlgmr.msra.gmra.mxu1 %vm396_vm1, %v362_v5  ;;  %v366_v7 = vld [vmem:[%s2047_s29 + $0x98] sm:$0xff]  ;;  %v363_v9 = vld [vmem:[%s2047_s29 + $0x80] sm:$0xff]  ;;  %v349_v10 = vld [vmem:[%s2047_s29 + $0x10] sm:$0xff] }
  0x15   : > { %v367_v11 = vld [vmem:[%s2047_s29 + $0xa0] sm:$0xff]  ;;  %v382_v12 = vld [vmem:[%s2047_s29 + $0x118] sm:$0xff]  ;;  %v364_v13 = vld [vmem:[%s2047_s29 + $0x88] sm:$0xff] }
  0x16   : > { %v350_v14 = vld [vmem:[%s2047_s29 + $0x18] sm:$0xff]  ;;  %v368_v15 = vld [vmem:[%s2047_s29 + $0xa8] sm:$0xff]  ;;  %v383_v16 = vld [vmem:[%s2047_s29 + $0x120] sm:$0xff] }
  0x17   : > { %v755_v17 = vld [vmem:[%s2076_s8] sm:$0xff]  ;;  %v369_v19 = vld [vmem:[%s2047_s29 + $0xb0] sm:$0xff]  ;;  %v384_v20 = vld [vmem:[%s2047_s29 + $0x128] sm:$0xff] }
  0x18   : > { %v351_v18 = vld [vmem:[%s2047_s29 + $0x20] sm:$0xff]  ;;  %v756_v21 = vld [vmem:[%s2076_s8 + $0x8] sm:$0xff]  ;;  %v370_v23 = vld [vmem:[%s2047_s29 + $0xb8] sm:$0xff] }
  0x19   : > { %v352_v22 = vld [vmem:[%s2047_s29 + $0x28] sm:$0xff]  ;;  %v385_v24 = vld [vmem:[%s2047_s29 + $0x130] sm:$0xff]  ;;  %v371_v27 = vld [vmem:[%s2047_s29 + $0xc0] sm:$0xff] }
  0x1a   : > { %v757_v25 = vld [vmem:[%s2076_s8 + $0x10] sm:$0xff]  ;;  %v386_v28 = vld [vmem:[%s2047_s29 + $0x138] sm:$0xff]  ;;  %v372_v31 = vld [vmem:[%s2047_s29 + $0xc8] sm:$0xff] }
  0x1b   : > { %1847 = vmatmul.msk.f32.gmra.mxu0 %vm396_vm1, %v348_v6  ;;  %1865 = vmatmul.msk.f32.gmra.mxu2 %vm396_vm1, %v366_v7  ;;  %v353_v26 = vld [vmem:[%s2047_s29 + $0x30] sm:$0xff]  ;;  %v758_v29 = vld [vmem:[%s2076_s8 + $0x18] sm:$0xff]  ;;  %v387_v32 = vld [vmem:[%s2047_s29 + $0x140] sm:$0xff] }
  0x1c   : > { %1880 = vmatmul.msk.f32.gmra.mxu3 %vm396_vm1, %v381_v8  ;;  %1862 = vmatmul.msk.f32.gmra.mxu1 %vm396_vm1, %v363_v9  ;;  %v354_v30 = vld [vmem:[%s2047_s29 + $0x38] sm:$0xff]  ;;  %v759_v33 = vld [vmem:[%s2076_s8 + $0x20] sm:$0xff]  ;;  %v373_v35 = vld [vmem:[%s2047_s29 + $0xd0] sm:$0xff] }
  0x1d   : > { %v355_v34 = vld [vmem:[%s2047_s29 + $0x40] sm:$0xff]  ;;  %v388_v36 = vld [vmem:[%s2047_s29 + $0x148] sm:$0xff]  ;;  %v374_v39 = vld [vmem:[%s2047_s29 + $0xd8] sm:$0xff] }
  0x1e   : > { %v760_v37 = vld [vmem:[%s2076_s8 + $0x28] sm:$0xff]  ;;  %v389_v40 = vld [vmem:[%s2047_s29 + $0x150] sm:$0xff]  ;;  %v375_v43 = vld [vmem:[%s2047_s29 + $0xe0] sm:$0xff] }
  0x1f   : > { %v356_v38 = vld [vmem:[%s2047_s29 + $0x48] sm:$0xff]  ;;  %v761_v41 = vld [vmem:[%s2076_s8 + $0x30] sm:$0xff]  ;;  %v390_v44 = vld [vmem:[%s2047_s29 + $0x158] sm:$0xff] }
  0x20   : > { %v357_v42 = vld [vmem:[%s2047_s29 + $0x50] sm:$0xff]  ;;  %v762_v45 = vld [vmem:[%s2076_s8 + $0x38] sm:$0xff]  ;;  %v376_v47 = vld [vmem:[%s2047_s29 + $0xe8] sm:$0xff] }
  0x21   : > { %v358_v46 = vld [vmem:[%s2047_s29 + $0x58] sm:$0xff]  ;;  %v391_v48 = vld [vmem:[%s2047_s29 + $0x160] sm:$0xff]  ;;  %v377_v51 = vld [vmem:[%s2047_s29 + $0xf0] sm:$0xff] }
  0x22   : > { %v763_v49 = vld [vmem:[%s2076_s8 + $0x40] sm:$0xff]  ;;  %v392_v52 = vld [vmem:[%s2047_s29 + $0x168] sm:$0xff]  ;;  %v378_v55 = vld [vmem:[%s2047_s29 + $0xf8] sm:$0xff] }
  0x23   : > { %1848 = vmatmul.msk.f32.gmra.mxu0 %vm396_vm1, %v349_v10  ;;  %1866 = vmatmul.msk.f32.gmra.mxu2 %vm396_vm1, %v367_v11  ;;  %v359_v50 = vld [vmem:[%s2047_s29 + $0x60] sm:$0xff]  ;;  %v764_v53 = vld [vmem:[%s2076_s8 + $0x48] sm:$0xff]  ;;  %v393_v56 = vld [vmem:[%s2047_s29 + $0x170] sm:$0xff] }
  0x24   : > { %1881 = vmatmul.msk.f32.gmra.mxu3 %vm396_vm1, %v382_v12  ;;  %1863 = vmatmul.msk.f32.gmra.mxu1 %vm396_vm1, %v364_v13  ;;  %v360_v54 = vld [vmem:[%s2047_s29 + $0x68] sm:$0xff]  ;;  %v765_v57 = vld [vmem:[%s2076_s8 + $0x50] sm:$0xff]  ;;  %v379_v59 = vld [vmem:[%s2047_s29 + $0x100] sm:$0xff] }
  0x25   : > { %v361_v58 = vld [vmem:[%s2047_s29 + $0x70] sm:$0xff]  ;;  %v394_v60 = vld [vmem:[%s2047_s29 + $0x178] sm:$0xff] }
  0x26   : > { %v766_v61 = vld [vmem:[%s2076_s8 + $0x58] sm:$0xff]  ;;  %s1911_s8 = sshll.u32 %s3627_s18, 8 }
  0x27   : > { %s2897_s10 = scalar_lea.vmem %s3365_s5, %s1911_s8 }
  0x2b   : > { %1849 = vmatmul.msk.f32.gmra.mxu0 %vm396_vm1, %v350_v14  ;;  %1867 = vmatmul.msk.f32.gmra.mxu2 %vm396_vm1, %v368_v15 }
  0x2c   : > { %1882 = vmatmul.msk.f32.gmra.mxu3 %vm396_vm1, %v383_v16  ;;  %1895 = vmatmul.msk.f32.vlgmr.msrb.gmra.mxu1 %vm396_vm1, %v755_v17  ;;  %v2195_v16 = vld [vmem:[%s3363_s3] ss:$0 sm:$0xff]  ;;  %v2200_v17 = vld [vmem:[%s3363_s3 + $0x3] ss:$0 sm:$0xff] }
  0x33   : > { %1850 = vmatmul.msk.f32.gmra.mxu0 %vm396_vm1, %v351_v18  ;;  %1868 = vmatmul.msk.f32.gmra.mxu2 %vm396_vm1, %v369_v19  ;;  %v2205_v19 = vld [vmem:[%s3363_s3 + $0x6] ss:$0 sm:$0xff] }
  0x34   : > { %1883 = vmatmul.msk.f32.gmra.mxu3 %vm396_vm1, %v384_v20  ;;  %1896 = vmatmul.msk.f32.gmra.mxu1 %vm396_vm1, %v756_v21  ;;  %v2210_v20 = vld [vmem:[%s3363_s3 + $0x1] ss:$0 sm:$0xff] }
  0x3b   : > { %1851 = vmatmul.msk.f32.gmra.mxu0 %vm396_vm1, %v352_v22  ;;  %1869 = vmatmul.msk.f32.gmra.mxu2 %vm396_vm1, %v370_v23  ;;  %v2215_v23 = vld [vmem:[%s3363_s3 + $0x2] ss:$0 sm:$0xff] }
  0x3c   : > { %1884 = vmatmul.msk.f32.gmra.mxu3 %vm396_vm1, %v385_v24  ;;  %1897 = vmatmul.msk.f32.gmra.mxu1 %vm396_vm1, %v757_v25 }
  0x43   : > { %1852 = vmatmul.msk.f32.gmra.mxu0 %vm396_vm1, %v353_v26  ;;  %1870 = vmatmul.msk.f32.gmra.mxu2 %vm396_vm1, %v371_v27  ;;  %v2220_v26 = vld [vmem:[%s3363_s3 + $0x4] ss:$0 sm:$0xff]  ;;  %v2225_v27 = vld [vmem:[%s3363_s3 + $0x7] ss:$0 sm:$0xff] }
  0x44   : > { %1885 = vmatmul.msk.f32.gmra.mxu3 %vm396_vm1, %v386_v28  ;;  %1898 = vmatmul.msk.f32.gmra.mxu1 %vm396_vm1, %v758_v29 }
  0x4b   : > { %1853 = vmatmul.msk.f32.gmra.mxu0 %vm396_vm1, %v354_v30  ;;  %1871 = vmatmul.msk.f32.gmra.mxu2 %vm396_vm1, %v372_v31 }
  0x4c   : > { %1886 = vmatmul.msk.f32.gmra.mxu3 %vm396_vm1, %v387_v32  ;;  %1899 = vmatmul.msk.f32.gmra.mxu1 %vm396_vm1, %v759_v33 }
  0x53   : > { %1854 = vmatmul.msk.f32.gmra.mxu0 %vm396_vm1, %v355_v34  ;;  %1872 = vmatmul.msk.f32.gmra.mxu2 %vm396_vm1, %v373_v35 }
  0x54   : > { %1887 = vmatmul.msk.f32.gmra.mxu3 %vm396_vm1, %v388_v36  ;;  %1900 = vmatmul.msk.f32.gmra.mxu1 %vm396_vm1, %v760_v37 }
  0x5b   : > { %1855 = vmatmul.msk.f32.gmra.mxu0 %vm396_vm1, %v356_v38  ;;  %1873 = vmatmul.msk.f32.gmra.mxu2 %vm396_vm1, %v374_v39 }
  0x5c   : > { %1888 = vmatmul.msk.f32.gmra.mxu3 %vm396_vm1, %v389_v40  ;;  %1901 = vmatmul.msk.f32.gmra.mxu1 %vm396_vm1, %v761_v41  ;;  %v2247_v40 = vld [vmem:[%s3363_s3 + $0x5] ss:$0 sm:$0xff] }
  0x63   : > { %1856 = vmatmul.msk.f32.gmra.mxu0 %vm396_vm1, %v357_v42  ;;  %1874 = vmatmul.msk.f32.gmra.mxu2 %vm396_vm1, %v375_v43 }
  0x64   : > { %1889 = vmatmul.msk.f32.gmra.mxu3 %vm396_vm1, %v390_v44  ;;  %1902 = vmatmul.msk.f32.gmra.mxu1 %vm396_vm1, %v762_v45 }
  0x6b   : > { %1857 = vmatmul.msk.f32.gmra.mxu0 %vm396_vm1, %v358_v46  ;;  %1875 = vmatmul.msk.f32.gmra.mxu2 %vm396_vm1, %v376_v47  ;;  %v2265_v47 = vld [vmem:[%s3363_s3 + $0x8] ss:$0 sm:$0xff] }
  0x6c   : > { %1890 = vmatmul.msk.f32.gmra.mxu3 %vm396_vm1, %v391_v48  ;;  %1903 = vmatmul.msk.f32.gmra.mxu1 %vm396_vm1, %v763_v49 }
  0x73   : > { %1858 = vmatmul.msk.f32.gmra.mxu0 %vm396_vm1, %v359_v50  ;;  %1876 = vmatmul.msk.f32.gmra.mxu2 %vm396_vm1, %v377_v51 }
  0x74   : > { %1891 = vmatmul.msk.f32.gmra.mxu3 %vm396_vm1, %v392_v52  ;;  %1904 = vmatmul.msk.f32.gmra.mxu1 %vm396_vm1, %v764_v53 }
  0x7b   : > { %1859 = vmatmul.msk.f32.gmra.mxu0 %vm396_vm1, %v360_v54  ;;  %1877 = vmatmul.msk.f32.gmra.mxu2 %vm396_vm1, %v378_v55 }
  0x7c   : > { %1892 = vmatmul.msk.f32.gmra.mxu3 %vm396_vm1, %v393_v56  ;;  %1905 = vmatmul.msk.f32.gmra.mxu1 %vm396_vm1, %v765_v57 }
  0x83   : > { %1860 = vmatmul.msk.f32.gmra.mxu0 %vm396_vm1, %v361_v58  ;;  %1878 = vmatmul.msk.f32.gmra.mxu2 %vm396_vm1, %v379_v59 }
  0x84   : > { %1893 = vmatmul.msk.f32.gmra.mxu3 %vm396_vm1, %v394_v60  ;;  %1906 = vmatmul.msk.f32.gmra.mxu1 %vm396_vm1, %v766_v61 }
  0x90   : > { %v562_v62 = vpop.f32.mrf.mxu0 }
  0x91   : > { %707 = vst.msk [vmem:[#allocation2] sm:$0xff] %vm706_vm2, %v562_v62  ;;  %v607_v63 = vpop.f32.mrf.mxu1 }
  0x92   : > { %722 = vst.msk [vmem:[#allocation2 + $0x78] sm:$0xff] %vm706_vm2, %v607_v63 }
  0x96   : > { %v616_v0 = vpop.f32.mrf.mxu2 }
  0x97   : > { %725 = vst.msk [vmem:[#allocation2 + $0x90] sm:$0xff] %vm706_vm2, %v616_v0  ;;  %v661_v1 = vpop.f32.mrf.mxu3 }
  0x98   : > { %740 = vst.msk [vmem:[#allocation2 + $0x108] sm:$0xff] %vm706_vm2, %v661_v1  ;;  %v565_v2 = vpop.f32.mrf.mxu0  ;;  %v873_v18 = vld [vmem:[#allocation2] sm:$0xff] }
  0x99   : > { %708 = vst.msk [vmem:[#allocation2 + $0x8] sm:$0xff] %vm706_vm2, %v565_v2  ;;  %v610_v3 = vpop.f32.mrf.mxu1  ;;  %v883_v21 = vld [vmem:[#allocation2 + $0x78] sm:$0xff]  ;;  %v2229_v29 = vmul.f32 %v2195_v16, %v873_v18 }
  0x9a   : > { %723 = vst.msk [vmem:[#allocation2 + $0x80] sm:$0xff] %vm706_vm2, %v610_v3  ;;  %v2233_v34 = vmul.f32 %v2195_v16, %v883_v21  ;;  %v2236_v35 = vmul.f32 %v2200_v17, %v883_v21  ;;  %v2239_v36 = vmul.f32 %v2205_v19, %v883_v21 }
  0x9e   : > { %v619_v4 = vpop.f32.mrf.mxu2  ;;  %v885_v22 = vld [vmem:[#allocation2 + $0x90] sm:$0xff] }
  0x9f   : > { %726 = vst.msk [vmem:[#allocation2 + $0x98] sm:$0xff] %vm706_vm2, %v619_v4  ;;  %v664_v5 = vpop.f32.mrf.mxu3  ;;  %v895_v25 = vld [vmem:[#allocation2 + $0x108] sm:$0xff]  ;;  %v2242_v37 = vmul.f32 %v2195_v16, %v885_v22  ;;  %v2251_v42 = vmul.f32 %v2200_v17, %v885_v22  ;;  %v2254_v43 = vmul.f32 %v2205_v19, %v885_v22 }
  0xa0   : > { %741 = vst.msk [vmem:[#allocation2 + $0x110] sm:$0xff] %vm706_vm2, %v664_v5  ;;  %v568_v6 = vpop.f32.mrf.mxu0  ;;  %v874_v30 = vld [vmem:[#allocation2 + $0x8] sm:$0xff]  ;;  %v2257_v44 = vmul.f32 %v2195_v16, %v895_v25  ;;  %v2260_v45 = vmul.f32 %v2200_v17, %v895_v25  ;;  %v2269_v48 = vmul.f32 %v2205_v19, %v895_v25 }
  0xa1   : > { %709 = vst.msk [vmem:[#allocation2 + $0x10] sm:$0xff] %vm706_vm2, %v568_v6  ;;  %v613_v7 = vpop.f32.mrf.mxu1  ;;  %v1079_v31 = vld [vmem:[#allocation2 + $0x2] sm:$0xff]  ;;  %v1089_v39 = vld [vmem:[#allocation2 + $0x7a] sm:$0xff]  ;;  %v2272_v49 = vmul.f32 %v2195_v16, %v874_v30 }
  0xa2   : > { %724 = vst.msk [vmem:[#allocation2 + $0x88] sm:$0xff] %vm706_vm2, %v613_v7  ;;  %v1317_v32 = vld [vmem:[#allocation2 + $0x4] sm:$0xff]  ;;  %v1327_v46 = vld [vmem:[#allocation2 + $0x7c] sm:$0xff]  ;;  %v2275_v50 = vmul.f32 %v2210_v20, %v1079_v31  ;;  %v2290_v56 = vmul.f32 %v2210_v20, %v1089_v39  ;;  %v2293_v59 = vmul.f32 %v2220_v26, %v1089_v39  ;;  %v2296_v60 = vmul.f32 %v2225_v27, %v1089_v39 }
  0xa3   : > { %v884_v38 = vld [vmem:[#allocation2 + $0x80] sm:$0xff]  ;;  %3366 = vst [vmem:[#allocation3_spill] sm:$0xff] %v2251_v42  ;;  %v2278_v51 = vmul.f32 %v2215_v23, %v1317_v32  ;;  %v2299_v61 = vmul.f32 %v2215_v23, %v1327_v46  ;;  %v2302_v62 = vmul.f32 %v2247_v40, %v1327_v46  ;;  %v2305_v0 = vmul.f32 %v2265_v47, %v1327_v46 }
  0xa4   : > { %3367 = vst [vmem:[#allocation4_spill] sm:$0xff] %v2254_v43  ;;  %v2281_v53 = vmul.f32 %v2195_v16, %v884_v38  ;;  %v2284_v54 = vmul.f32 %v2200_v17, %v884_v38  ;;  %v2287_v55 = vmul.f32 %v2205_v19, %v884_v38 }
  0xa5   : > { %3368 = vst [vmem:[#allocation5_spill] sm:$0xff] %v2275_v50 }
  0xa6   : > { %v622_v8 = vpop.f32.mrf.mxu2  ;;  %3369 = vst [vmem:[#allocation6_spill] sm:$0xff] %v2278_v51  ;;  %v886_v52 = vld [vmem:[#allocation2 + $0x98] sm:$0xff] }
  0xa7   : > { %727 = vst.msk [vmem:[#allocation2 + $0xa0] sm:$0xff] %vm706_vm2, %v622_v8  ;;  %v667_v9 = vpop.f32.mrf.mxu3  ;;  %v1091_v57 = vld [vmem:[#allocation2 + $0x92] sm:$0xff]  ;;  %v2308_v1 = vmul.f32 %v2195_v16, %v886_v52  ;;  %v2311_v2 = vmul.f32 %v2200_v17, %v886_v52  ;;  %v2314_v3 = vmul.f32 %v2205_v19, %v886_v52  ;;  %v1101_v4 = vld [vmem:[#allocation2 + $0x10a] sm:$0xff] }
  0xa8   : > { %742 = vst.msk [vmem:[#allocation2 + $0x118] sm:$0xff] %vm706_vm2, %v667_v9  ;;  %v571_v10 = vpop.f32.mrf.mxu0  ;;  %v1329_v58 = vld [vmem:[#allocation2 + $0x94] sm:$0xff]  ;;  %v2317_v6 = vmul.f32 %v2210_v20, %v1091_v57  ;;  %v2320_v7 = vmul.f32 %v2220_v26, %v1091_v57  ;;  %v2323_v8 = vmul.f32 %v2225_v27, %v1091_v57  ;;  %v1318_v21 = vld [vmem:[#allocation2 + $0xc] sm:$0xff]  ;;  %v2349_v30 = vmul.f32 %v2220_v26, %v1101_v4 }
  0xa9   : > { %710 = vst.msk [vmem:[#allocation2 + $0x18] sm:$0xff] %vm706_vm2, %v571_v10  ;;  %v824_v11 = vpop.f32.mrf.mxu1  ;;  %v896_v63 = vld [vmem:[#allocation2 + $0x110] sm:$0xff]  ;;  %v2326_v9 = vmul.f32 %v2215_v23, %v1329_v58  ;;  %v1090_v22 = vld [vmem:[#allocation2 + $0x82] sm:$0xff]  ;;  %v2352_v31 = vmul.f32 %v2225_v27, %v1101_v4 }
  0xaa   : > { %861 = vst.msk [vmem:[#allocation2 + $0x180] sm:$0xff] %vm706_vm2, %v824_v11  ;;  %v1339_v10 = vld [vmem:[#allocation2 + $0x10c] sm:$0xff]  ;;  %v2339_v18 = vmul.f32 %v2200_v17, %v896_v63  ;;  %v2343_v25 = vmul.f32 %v2205_v19, %v896_v63  ;;  %v1328_v32 = vld [vmem:[#allocation2 + $0x84] sm:$0xff] }
  0xab   : > { %3370 = vst [vmem:[#allocation7_spill] sm:$0xff] %v2299_v61  ;;  %v1080_v11 = vld [vmem:[#allocation2 + $0xa] sm:$0xff]  ;;  %v2356_v39 = vmul.f32 %v2215_v23, %v1339_v10  ;;  %v2362_v46 = vmul.f32 %v2265_v47, %v1339_v10 }
  0xac   : > { %3371 = vst [vmem:[#allocation8_spill] sm:$0xff] %v2311_v2  ;;  %v2365_v52 = vmul.f32 %v2210_v20, %v1080_v11  ;;  %v2381_v11 = vmul.f32 %v2215_v23, %v1328_v32 }
  0xad   : > { %3372 = vst [vmem:[#allocation9_spill] sm:$0xff] %v2314_v3 }
  0xae   : > { %v625_v12 = vpop.f32.mrf.mxu2  ;;  %3373 = vst [vmem:[#allocation10_spill] sm:$0xff] %v2317_v6  ;;  %v1330_v57 = vld [vmem:[#allocation2 + $0x9c] sm:$0xff] }
  0xaf   : > { %728 = vst.msk [vmem:[#allocation2 + $0xa8] sm:$0xff] %vm706_vm2, %v625_v12  ;;  %v670_v13 = vpop.f32.mrf.mxu3 }
  0xb0   : > { %743 = vst.msk [vmem:[#allocation2 + $0x120] sm:$0xff] %vm706_vm2, %v670_v13  ;;  %v574_v14 = vpop.f32.mrf.mxu0  ;;  %v2330_v13 = vmul.f32 %v2247_v40, %v1329_v58 }
  0xb1   : > { %711 = vst.msk [vmem:[#allocation2 + $0x20] sm:$0xff] %vm706_vm2, %v574_v14  ;;  %v827_v15 = vpop.f32.mrf.mxu1  ;;  %v2333_v14 = vmul.f32 %v2265_v47, %v1329_v58  ;;  %v2369_v58 = vmul.f32 %v2215_v23, %v1318_v21  ;;  %v2387_v21 = vmul.f32 %v2265_v47, %v1328_v32  ;;  %v905_v51 = vld [vmem:[#allocation2 + $0x180] sm:$0xff] }
  0xb2   : > { %862 = vst.msk [vmem:[#allocation2 + $0x188] sm:$0xff] %vm706_vm2, %v827_v15  ;;  %v2336_v15 = vmul.f32 %v2195_v16, %v896_v63  ;;  %v2372_v63 = vmul.f32 %v2210_v20, %v1090_v22 }
  0xb3   : > { %3374 = vst [vmem:[#allocation11_spill] sm:$0xff] %v2320_v7 }
  0xb4   : > { %3375 = vst [vmem:[#allocation12_spill] sm:$0xff] %v2323_v8 }
  0xb5   : > { %3376 = vst [vmem:[#allocation13_spill] sm:$0xff] %v2326_v9  ;;  %v2399_v9 = vmul.f32 %v2215_v23, %v1330_v57 }
  0xb6   : > { %v628_v24 = vpop.f32.mrf.mxu2  ;;  %3377 = vst [vmem:[#allocation14_spill] sm:$0xff] %v2330_v13  ;;  %v875_v13 = vld [vmem:[#allocation2 + $0x18] sm:$0xff] }
  0xb7   : > { %729 = vst.msk [vmem:[#allocation2 + $0xb0] sm:$0xff] %vm706_vm2, %v628_v24  ;;  %v673_v28 = vpop.f32.mrf.mxu3  ;;  %v2428_v2 = vmul.f32 %v2195_v16, %v875_v13 }
  0xb8   : > { %744 = vst.msk [vmem:[#allocation2 + $0x128] sm:$0xff] %vm706_vm2, %v673_v28  ;;  %v577_v33 = vpop.f32.mrf.mxu0  ;;  %v2346_v28 = vmul.f32 %v2210_v20, %v1101_v4  ;;  %v2375_v4 = vmul.f32 %v2220_v26, %v1090_v22 }
  0xb9   : > { %712 = vst.msk [vmem:[#allocation2 + $0x28] sm:$0xff] %vm706_vm2, %v577_v33  ;;  %v830_v41 = vpop.f32.mrf.mxu1  ;;  %v1092_v33 = vld [vmem:[#allocation2 + $0x9a] sm:$0xff]  ;;  %v906_v6 = vld [vmem:[#allocation2 + $0x188] sm:$0xff] }
  0xba   : > { %863 = vst.msk [vmem:[#allocation2 + $0x190] sm:$0xff] %vm706_vm2, %v830_v41  ;;  %v2359_v41 = vmul.f32 %v2247_v40, %v1339_v10  ;;  %v1102_v10 = vld [vmem:[#allocation2 + $0x112] sm:$0xff]  ;;  %v1111_v50 = vld [vmem:[#allocation2 + $0x182] sm:$0xff] }
  0xbb   : > { %3378 = vst [vmem:[#allocation15_spill] sm:$0xff] %v2333_v14  ;;  %v2402_v14 = vmul.f32 %v2247_v40, %v1330_v57  ;;  %v2411_v8 = vmul.f32 %v2220_v26, %v1102_v10 }
  0xbc   : > { %3379 = vst [vmem:[#allocation16_spill] sm:$0xff] %v2346_v28 }
  0xbd   : > { %3380 = vst [vmem:[#allocation17_spill] sm:$0xff] %v2356_v39  ;;  %v2393_v39 = vmul.f32 %v2220_v26, %v1092_v33 }
  0xbe   : > { %v631_v5 = vpop.f32.mrf.mxu2  ;;  %3381 = vst [vmem:[#allocation18_spill] sm:$0xff] %v2359_v41 }
  0xbf   : > { %730 = vst.msk [vmem:[#allocation2 + $0xb8] sm:$0xff] %vm706_vm2, %v631_v5  ;;  %v676_v12 = vpop.f32.mrf.mxu3  ;;  %v2378_v5 = vmul.f32 %v2225_v27, %v1090_v22  ;;  %v2396_v22 = vmul.f32 %v2225_v27, %v1092_v33 }
  0xc0   : > { %745 = vst.msk [vmem:[#allocation2 + $0x130] sm:$0xff] %vm706_vm2, %v676_v12  ;;  %v580_v24 = vpop.f32.mrf.mxu0  ;;  %v887_v12 = vld [vmem:[#allocation2 + $0xa8] sm:$0xff] }
  0xc1   : > { %713 = vst.msk [vmem:[#allocation2 + $0x30] sm:$0xff] %vm706_vm2, %v580_v24  ;;  %v833_v38 = vpop.f32.mrf.mxu1  ;;  %v2384_v24 = vmul.f32 %v2247_v40, %v1328_v32  ;;  %v2405_v32 = vmul.f32 %v2265_v47, %v1330_v57  ;;  %v2437_v28 = vmul.f32 %v2195_v16, %v887_v12 }
  0xc2   : > { %3382 = vst [vmem:[#allocation19_spill] sm:$0xff] %v2362_v46  ;;  %v1350_v46 = vld [vmem:[#allocation2 + $0x18c] sm:$0xff] }
  0xc3   : > { %3383 = vst [vmem:[#allocation20_spill] sm:$0xff] %v2365_v52  ;;  %v888_v52 = vld [vmem:[#allocation2 + $0xb0] sm:$0xff] }
  0xc4   : > { %864 = vst.msk [vmem:[#allocation2 + $0x198] sm:$0xff] %vm706_vm2, %v833_v38  ;;  %v2390_v38 = vmul.f32 %v2210_v20, %v1092_v33  ;;  %v959_v33 = vmul.f32 %v2200_v17, %v887_v12 }
  0xc5   : > { %3384 = vst [vmem:[#allocation21_spill] sm:$0xff] %v2369_v58  ;;  %v1340_v58 = vld [vmem:[#allocation2 + $0x114] sm:$0xff] }
  0xc6   : > { %3385 = vst [vmem:[#allocation22_spill] sm:$0xff] %v2375_v4  ;;  %v2421_v7 = vmul.f32 %v2247_v40, %v1340_v58  ;;  %v2424_v57 = vmul.f32 %v2265_v47, %v1340_v58  ;;  %v1341_v4 = vld [vmem:[#allocation2 + $0x124] sm:$0xff] }
  0xc7   : > { %3386 = vst [vmem:[#allocation23_spill] sm:$0xff] %v2378_v5  ;;  %v679_v3 = vpop.f32.mrf.mxu3 }
  0xc8   : > { %3387 = vst [vmem:[#allocation24_spill] sm:$0xff] %v2381_v11  ;;  %v583_v43 = vpop.f32.mrf.mxu0  ;;  %v2454_v11 = vadd.f32 %v959_v33, %v2233_v34  ;;  %v2471_v34 = vmul.f32 %v2205_v19, %v906_v6  ;;  %v1331_v33 = vld [vmem:[#allocation2 + $0xac] sm:$0xff] }
  0xc9   : > { %3388 = vst [vmem:[#allocation25_spill] sm:$0xff] %v2384_v24  ;;  %v1093_v24 = vld [vmem:[#allocation2 + $0xaa] sm:$0xff] }
  0xca   : > { %3389 = vst [vmem:[#allocation26_spill] sm:$0xff] %v2387_v21  ;;  %v960_v21 = vmul.f32 %v2200_v17, %v888_v52  ;;  %v2498_v5 = vmul.f32 %v2225_v27, %v1093_v24 }
  0xcb   : > { %3390 = vst [vmem:[#allocation27_spill] sm:$0xff] %v2390_v38  ;;  %v2408_v38 = vmul.f32 %v2210_v20, %v1102_v10 }
  0xcc   : > { %3391 = vst [vmem:[#allocation28_spill] sm:$0xff] %v2393_v39  ;;  %v634_v39 = vpop.f32.mrf.mxu2 }
  0xcd   : > { %3392 = vst [vmem:[#allocation29_spill] sm:$0xff] %v2396_v22  ;;  %v897_v22 = vld [vmem:[#allocation2 + $0x120] sm:$0xff] }
  0xce   : > { %3393 = vst [vmem:[#allocation30_spill] sm:$0xff] %v2399_v9  ;;  %v2415_v9 = vmul.f32 %v2225_v27, %v1102_v10  ;;  %v2431_v10 = vmul.f32 %v2200_v17, %v905_v51  ;;  %v2444_v13 = vmul.f32 %v2195_v16, %v897_v22  ;;  %v2447_v42 = vmul.f32 %v2200_v17, %v897_v22 }
  0xcf   : > { %3394 = vst [vmem:[#allocation31_spill] sm:$0xff] %v2402_v14  ;;  %v2418_v14 = vmul.f32 %v2215_v23, %v1340_v58  ;;  %v1319_v58 = vld [vmem:[#allocation2 + $0x1c] sm:$0xff] }
  0xd0   : > { %3395 = vst [vmem:[#allocation32_spill] sm:$0xff] %v2405_v32  ;;  %v876_v32 = vld [vmem:[#allocation2 + $0x20] sm:$0xff] }
  0xd1   : > { %3396 = vst [vmem:[#allocation33_spill] sm:$0xff] %v2408_v38  ;;  %v1081_v38 = vld [vmem:[#allocation2 + $0x1a] sm:$0xff] }
  0xd2   : > { %3397 = vst [vmem:[#allocation34_spill] sm:$0xff] %v2411_v8  ;;  %v2492_v8 = vmul.f32 %v2210_v20, %v1093_v24 }
  0xd3   : > { %3398 = vst [vmem:[#allocation35_spill] sm:$0xff] %v2415_v9  ;;  %v1103_v9 = vld [vmem:[#allocation2 + $0x122] sm:$0xff] }
  0xd4   : > { %3399 = vst [vmem:[#allocation36_spill] sm:$0xff] %v2418_v14  ;;  %v2434_v14 = vmul.f32 %v2205_v19, %v905_v51  ;;  %v2450_v51 = vmul.f32 %v2205_v19, %v897_v22  ;;  %v2465_v22 = vmul.f32 %v2215_v23, %v1319_v58  ;;  %v2486_v58 = vmul.f32 %v2195_v16, %v888_v52 }
  0xd5   : > { %3400 = vst [vmem:[#allocation37_spill] sm:$0xff] %v2421_v7  ;;  %v836_v7 = vpop.f32.mrf.mxu1 }
  0xd6   : > { %3401 = vst [vmem:[#allocation38_spill] sm:$0xff] %v2424_v57  ;;  %v1349_v57 = vld [vmem:[#allocation2 + $0x184] sm:$0xff] }
  0xd7   : > { %731 = vst.msk [vmem:[#allocation2 + $0xc0] sm:$0xff] %vm706_vm2, %v634_v39  ;;  %v2441_v39 = vmul.f32 %v2205_v19, %v887_v12  ;;  %v2460_v12 = vmul.f32 %v2210_v20, %v1081_v38  ;;  %v2477_v38 = vmul.f32 %v2225_v27, %v1111_v50 }
  0xd8   : > { %746 = vst.msk [vmem:[#allocation2 + $0x138] sm:$0xff] %vm706_vm2, %v679_v3  ;;  %v2457_v3 = vmul.f32 %v2195_v16, %v876_v32  ;;  %v2474_v32 = vmul.f32 %v2220_v26, %v1111_v50  ;;  %v2495_v50 = vmul.f32 %v2220_v26, %v1093_v24 }
  0xd9   : > { %3402 = vst [vmem:[#allocation39_spill] sm:$0xff] %v2447_v42  ;;  %v898_v42 = vld [vmem:[#allocation2 + $0x128] sm:$0xff] }
  0xda   : > { %3403 = vst [vmem:[#allocation40_spill] sm:$0xff] %v2450_v51  ;;  %v2480_v51 = vmul.f32 %v2247_v40, %v1349_v57  ;;  %v2516_v24 = vmul.f32 %v2200_v17, %v898_v42 }
  0xdb   : > { %714 = vst.msk [vmem:[#allocation2 + $0x38] sm:$0xff] %vm706_vm2, %v583_v43  ;;  %v2468_v43 = vmul.f32 %v2200_v17, %v906_v6  ;;  %v2489_v6 = vmul.f32 %v2205_v19, %v888_v52  ;;  %v2510_v52 = vmul.f32 %v2265_v47, %v1331_v33 }
  0xdc   : > { %865 = vst.msk [vmem:[#allocation2 + $0x1a0] sm:$0xff] %vm706_vm2, %v836_v7  ;;  %v2483_v7 = vmul.f32 %v2265_v47, %v1349_v57  ;;  %v2501_v57 = vadd.f32 %v960_v21, %v2281_v53  ;;  %v2519_v53 = vmul.f32 %v2205_v19, %v898_v42  ;;  %v2522_v21 = vmul.f32 %v2210_v20, %v1103_v9 }
  0xdd   : > { %3404 = vst [vmem:[#allocation41_spill] sm:$0xff] %v2468_v43  ;;  %v1112_v43 = vld [vmem:[#allocation2 + $0x18a] sm:$0xff] }
  0xde   : > { %3405 = vst [vmem:[#allocation42_spill] sm:$0xff] %v2471_v34  ;;  %v2513_v34 = vmul.f32 %v2195_v16, %v898_v42  ;;  %v1094_v42 = vld [vmem:[#allocation2 + $0xb2] sm:$0xff] }
  0xdf   : > { %3406 = vst [vmem:[#allocation43_spill] sm:$0xff] %v2474_v32  ;;  %v637_v32 = vpop.f32.mrf.mxu2  ;;  %v899_v41 = vld [vmem:[#allocation2 + $0x138] sm:$0xff] }
  0xe0   : > { %3407 = vst [vmem:[#allocation44_spill] sm:$0xff] %v2477_v38  ;;  %v1320_v38 = vld [vmem:[#allocation2 + $0x24] sm:$0xff]  ;;  %v971_v61 = vmul.f32 %v2200_v17, %v899_v41 }
  0xe1   : > { %3408 = vst [vmem:[#allocation45_spill] sm:$0xff] %v2480_v51  ;;  %v2507_v51 = vmul.f32 %v2247_v40, %v1331_v33 }
  0xe2   : > { %3409 = vst [vmem:[#allocation46_spill] sm:$0xff] %v2483_v7  ;;  %v2504_v7 = vmul.f32 %v2215_v23, %v1331_v33  ;;  %v682_v33 = vpop.f32.mrf.mxu3 }
  0xe3   : > { %3410 = vst [vmem:[#allocation47_spill] sm:$0xff] %v2489_v6  ;;  %v1082_v6 = vld [vmem:[#allocation2 + $0x22] sm:$0xff] }
  0xe4   : > { %3411 = vst [vmem:[#allocation48_spill] sm:$0xff] %v2504_v7  ;;  %v2537_v7 = vmul.f32 %v2247_v40, %v1341_v4 }
  0xe5   : > { %3412 = vst [vmem:[#allocation49_spill] sm:$0xff] %v2507_v51  ;;  %v2526_v51 = vmul.f32 %v2220_v26, %v1103_v9 }
  0xe6   : > { %3413 = vst [vmem:[#allocation50_spill] sm:$0xff] %v2510_v52  ;;  %v2550_v52 = vmul.f32 %v2220_v26, %v1112_v43 }
  0xe7   : > { %3414 = vst [vmem:[#allocation51_spill] sm:$0xff] %v2513_v34  ;;  %v2529_v34 = vmul.f32 %v2225_v27, %v1103_v9  ;;  %v2546_v9 = vmul.f32 %v2215_v23, %v1320_v38  ;;  %v2563_v38 = vmul.f32 %v2265_v47, %v1350_v46 }
  0xe8   : > { %3415 = vst [vmem:[#allocation52_spill] sm:$0xff] %v2516_v24  ;;  %v2532_v24 = vmul.f32 %v2215_v23, %v1341_v4 }
  0xe9   : > { %3416 = vst [vmem:[#allocation53_spill] sm:$0xff] %v2519_v53  ;;  %v877_v53 = vld [vmem:[#allocation2 + $0x30] sm:$0xff] }
  0xea   : > { %3417 = vst [vmem:[#allocation54_spill] sm:$0xff] %v2522_v21  ;;  %v586_v21 = vpop.f32.mrf.mxu0 }
  0xeb   : > { %732 = vst.msk [vmem:[#allocation2 + $0xc8] sm:$0xff] %vm706_vm2, %v637_v32  ;;  %v2540_v32 = vmul.f32 %v2265_v47, %v1341_v4  ;;  %v1104_v4 = vld [vmem:[#allocation2 + $0x12a] sm:$0xff] }
  0xec   : > { %3418 = vst [vmem:[#allocation55_spill] sm:$0xff] %v2526_v51  ;;  %v2543_v51 = vmul.f32 %v2210_v20, %v1082_v6  ;;  %v2559_v6 = vadd.f32 %v971_v61, %v2257_v44 }
  0xed   : > { %3419 = vst [vmem:[#allocation56_spill] sm:$0xff] %v2529_v34  ;;  %v1332_v34 = vld [vmem:[#allocation2 + $0xb4] sm:$0xff] }
  0xee   : > { %3420 = vst [vmem:[#allocation57_spill] sm:$0xff] %v2532_v24  ;;  %v839_v24 = vpop.f32.mrf.mxu1  ;;  %v2576_v44 = vmul.f32 %v2215_v23, %v1332_v34  ;;  %v2579_v61 = vmul.f32 %v2247_v40, %v1332_v34 }
  0xef   : > { %747 = vst.msk [vmem:[#allocation2 + $0x140] sm:$0xff] %vm706_vm2, %v682_v33  ;;  %v2553_v33 = vmul.f32 %v2225_v27, %v1112_v43  ;;  %v1342_v43 = vld [vmem:[#allocation2 + $0x12c] sm:$0xff] }
  0xf0   : > { %3421 = vst [vmem:[#allocation58_spill] sm:$0xff] %v2537_v7  ;;  %v2556_v7 = vmul.f32 %v2247_v40, %v1350_v46  ;;  %v2582_v46 = vmul.f32 %v2265_v47, %v1332_v34  ;;  %v2601_v34 = vmul.f32 %v2265_v47, %v1342_v43 }
  0xf1   : > { %3422 = vst [vmem:[#allocation59_spill] sm:$0xff] %v2540_v32  ;;  %v889_v32 = vld [vmem:[#allocation2 + $0xc0] sm:$0xff] }
  0xf2   : > { %3423 = vst [vmem:[#allocation60_spill] sm:$0xff] %v2546_v9  ;;  %v2588_v9 = vmul.f32 %v2220_v26, %v1104_v4 }
  0xf3   : > { %715 = vst.msk [vmem:[#allocation2 + $0x40] sm:$0xff] %vm706_vm2, %v586_v21  ;;  %v2566_v21 = vmul.f32 %v2210_v20, %v1094_v42 }
  0xf4   : > { %3424 = vst [vmem:[#allocation61_spill] sm:$0xff] %v2550_v52  ;;  %v2569_v52 = vmul.f32 %v2220_v26, %v1094_v42 }
  0xf5   : > { %3425 = vst [vmem:[#allocation62_spill] sm:$0xff] %v2553_v33  ;;  %v949_v33 = vmul.f32 %v2200_v17, %v877_v53 }
  0xf6   : > { %3426 = vst [vmem:[#allocation63_spill] sm:$0xff] %v2556_v7  ;;  %v2573_v7 = vmul.f32 %v2225_v27, %v1094_v42  ;;  %v2591_v42 = vmul.f32 %v2225_v27, %v1104_v4 }
  0xf7   : > { %3427 = vst [vmem:[#allocation64_spill] sm:$0xff] %v2559_v6  ;;  %v878_v6 = vld [vmem:[#allocation2 + $0x38] sm:$0xff] }
  0xf8   : > { %866 = vst.msk [vmem:[#allocation2 + $0x1a8] sm:$0xff] %vm706_vm2, %v839_v24  ;;  %v907_v24 = vld [vmem:[#allocation2 + $0x198] sm:$0xff] }
  0xf9   : > { %3428 = vst [vmem:[#allocation65_spill] sm:$0xff] %v2563_v38  ;;  %v2585_v38 = vmul.f32 %v2210_v20, %v1104_v4  ;;  %v2610_v4 = vmul.f32 %v2200_v17, %v907_v24 }
  0xfa   : > { %3429 = vst [vmem:[#allocation66_spill] sm:$0xff] %v2566_v21  ;;  %v890_v21 = vld [vmem:[#allocation2 + $0xc8] sm:$0xff] }
  0xfb   : > { %3430 = vst [vmem:[#allocation67_spill] sm:$0xff] %v2569_v52  ;;  %v640_v52 = vpop.f32.mrf.mxu2 }
  0xfc   : > { %3431 = vst [vmem:[#allocation68_spill] sm:$0xff] %v2573_v7  ;;  %v961_v7 = vmul.f32 %v2200_v17, %v889_v32 }
  0xfd   : > { %3432 = vst [vmem:[#allocation69_spill] sm:$0xff] %v2576_v44  ;;  %v2595_v44 = vmul.f32 %v2215_v23, %v1342_v43 }
  0xfe   : > { %3433 = vst [vmem:[#allocation70_spill] sm:$0xff] %v2579_v61  ;;  %v2598_v61 = vmul.f32 %v2247_v40, %v1342_v43  ;;  %v900_v43 = vld [vmem:[#allocation2 + $0x140] sm:$0xff] }
  0xff   : > { %3434 = vst [vmem:[#allocation71_spill] sm:$0xff] %v2582_v46  ;;  %v2604_v46 = vmul.f32 %v2195_v16, %v877_v53  ;;  %v685_v53 = vpop.f32.mrf.mxu3 }
 0x100   : > { %3435 = vst [vmem:[#allocation72_spill] sm:$0xff] %v2585_v38  ;;  %v1083_v38 = vld [vmem:[#allocation2 + $0x32] sm:$0xff] }
 0x101   : > { %3436 = vst [vmem:[#allocation73_spill] sm:$0xff] %v2588_v9  ;;  %v2607_v9 = vadd.f32 %v949_v33, %v2229_v29  ;;  %v2621_v29 = vmul.f32 %v2205_v19, %v889_v32  ;;  %v2624_v33 = vmul.f32 %v2195_v16, %v899_v41 }
 0x102   : > { %3437 = vst [vmem:[#allocation74_spill] sm:$0xff] %v2591_v42  ;;  %v2613_v42 = vmul.f32 %v2205_v19, %v907_v24  ;;  %v2627_v24 = vmul.f32 %v2205_v19, %v899_v41  ;;  %v842_v41 = vpop.f32.mrf.mxu1 }
 0x103   : > { %3438 = vst [vmem:[#allocation75_spill] sm:$0xff] %v2595_v44  ;;  %v950_v44 = vmul.f32 %v2200_v17, %v878_v6 }
 0x104   : > { %3439 = vst [vmem:[#allocation76_spill] sm:$0xff] %v2598_v61  ;;  %v1321_v61 = vld [vmem:[#allocation2 + $0x34] sm:$0xff] }
 0x105   : > { %3440 = vst [vmem:[#allocation77_spill] sm:$0xff] %v2601_v34  ;;  %v2618_v34 = vmul.f32 %v2195_v16, %v889_v32  ;;  %v1113_v32 = vld [vmem:[#allocation2 + $0x19a] sm:$0xff] }
 0x106   : > { %3441 = vst [vmem:[#allocation78_spill] sm:$0xff] %v2604_v46  ;;  %v2642_v46 = vmul.f32 %v2220_v26, %v1083_v38 }
 0x107   : > { %3442 = vst [vmem:[#allocation79_spill] sm:$0xff] %v2607_v9  ;;  %v2631_v9 = vadd.f32 %v961_v7, %v2242_v37  ;;  %v2648_v37 = vmul.f32 %v2247_v40, %v1321_v61  ;;  %v962_v7 = vmul.f32 %v2200_v17, %v890_v21 }
 0x108   : > { %3443 = vst [vmem:[#allocation80_spill] sm:$0xff] %v2610_v4  ;;  %v589_v4 = vpop.f32.mrf.mxu0 }
 0x109   : > { %3444 = vst [vmem:[#allocation81_spill] sm:$0xff] %v2613_v42  ;;  %v908_v42 = vld [vmem:[#allocation2 + $0x1a0] sm:$0xff] }
 0x10a   : > { %733 = vst.msk [vmem:[#allocation2 + $0xd0] sm:$0xff] %vm706_vm2, %v640_v52  ;;  %v2634_v52 = vmul.f32 %v2195_v16, %v878_v6  ;;  %v1095_v6 = vld [vmem:[#allocation2 + $0xc2] sm:$0xff] }
 0x10b   : > { %3445 = vst [vmem:[#allocation82_spill] sm:$0xff] %v2618_v34  ;;  %v2637_v34 = vmul.f32 %v2210_v20, %v1083_v38  ;;  %v2659_v38 = vmul.f32 %v2205_v19, %v908_v42 }
 0x10c   : > { %3446 = vst [vmem:[#allocation83_spill] sm:$0xff] %v2621_v29  ;;  %v1351_v29 = vld [vmem:[#allocation2 + $0x19c] sm:$0xff] }
 0x10d   : > { %3447 = vst [vmem:[#allocation84_spill] sm:$0xff] %v2624_v33  ;;  %v972_v33 = vmul.f32 %v2200_v17, %v900_v43 }
 0x10e   : > { %748 = vst.msk [vmem:[#allocation2 + $0x148] sm:$0xff] %vm706_vm2, %v685_v53  ;;  %v2645_v53 = vmul.f32 %v2215_v23, %v1321_v61  ;;  %v2665_v61 = vmul.f32 %v2220_v26, %v1113_v32 }
 0x10f   : > { %3448 = vst [vmem:[#allocation85_spill] sm:$0xff] %v2631_v9 }
 0x110   : > { %3449 = vst [vmem:[#allocation86_spill] sm:$0xff] %v2634_v52 }
 0x111   : > { %3450 = vst [vmem:[#allocation87_spill] sm:$0xff] %v2637_v34  ;;  %v2653_v34 = vadd.f32 %v950_v44, %v2272_v49  ;;  %v2674_v49 = vmul.f32 %v2265_v47, %v1351_v29  ;;  %v1105_v44 = vld [vmem:[#allocation2 + $0x13a] sm:$0xff] }
 0x112   : > { %716 = vst.msk [vmem:[#allocation2 + $0x48] sm:$0xff] %vm706_vm2, %v589_v4  ;;  %v2656_v4 = vmul.f32 %v2200_v17, %v908_v42  ;;  %v2677_v42 = vmul.f32 %v2195_v16, %v890_v21 }
 0x113   : > { %3451 = vst [vmem:[#allocation88_spill] sm:$0xff] %v2642_v46  ;;  %v1333_v46 = vld [vmem:[#allocation2 + $0xc4] sm:$0xff] }
 0x114   : > { %3452 = vst [vmem:[#allocation89_spill] sm:$0xff] %v2645_v53  ;;  %v2662_v53 = vadd.f32 %v972_v33, %v2336_v15  ;;  %v2683_v15 = vmul.f32 %v2210_v20, %v1095_v6  ;;  %v2686_v33 = vmul.f32 %v2220_v26, %v1095_v6 }
 0x115   : > { %3453 = vst [vmem:[#allocation90_spill] sm:$0xff] %v2648_v37  ;;  %v2668_v37 = vmul.f32 %v2225_v27, %v1113_v32  ;;  %v1343_v32 = vld [vmem:[#allocation2 + $0x13c] sm:$0xff] }
 0x116   : > { %867 = vst.msk [vmem:[#allocation2 + $0x1b0] sm:$0xff] %vm706_vm2, %v842_v41  ;;  %v2671_v41 = vmul.f32 %v2247_v40, %v1351_v29  ;;  %v2692_v29 = vmul.f32 %v2225_v27, %v1095_v6  ;;  %v1114_v6 = vld [vmem:[#allocation2 + $0x1a2] sm:$0xff] }
 0x117   : > { %3454 = vst [vmem:[#allocation91_spill] sm:$0xff] %v2653_v34 }
 0x118   : > { %3455 = vst [vmem:[#allocation92_spill] sm:$0xff] %v2656_v4  ;;  %v2701_v4 = vmul.f32 %v2265_v47, %v1333_v46 }
 0x119   : > { %3456 = vst [vmem:[#allocation93_spill] sm:$0xff] %v2659_v38  ;;  %v2680_v38 = vmul.f32 %v2205_v19, %v890_v21  ;;  %v1084_v21 = vld [vmem:[#allocation2 + $0x3a] sm:$0xff] }
 0x11a   : > { %3457 = vst [vmem:[#allocation94_spill] sm:$0xff] %v2662_v53  ;;  %v2704_v53 = vmul.f32 %v2195_v16, %v900_v43 }
 0x11b   : > { %3458 = vst [vmem:[#allocation95_spill] sm:$0xff] %v2665_v61  ;;  %v643_v61 = vpop.f32.mrf.mxu2 }
 0x11c   : > { %3459 = vst [vmem:[#allocation96_spill] sm:$0xff] %v2668_v37  ;;  %v2689_v37 = vadd.f32 %v962_v7, %v2308_v1  ;;  %v2707_v1 = vmul.f32 %v2205_v19, %v900_v43  ;;  %v2710_v7 = vmul.f32 %v2210_v20, %v1105_v44  ;;  %v1352_v43 = vld [vmem:[#allocation2 + $0x1a4] sm:$0xff] }
 0x11d   : > { %3460 = vst [vmem:[#allocation97_spill] sm:$0xff] %v2671_v41  ;;  %v2698_v41 = vmul.f32 %v2247_v40, %v1333_v46 }
 0x11e   : > { %3461 = vst [vmem:[#allocation98_spill] sm:$0xff] %v2674_v49  ;;  %v2695_v49 = vmul.f32 %v2215_v23, %v1333_v46  ;;  %v2720_v46 = vmul.f32 %v2215_v23, %v1343_v32 }
 0x11f   : > { %3462 = vst [vmem:[#allocation99_spill] sm:$0xff] %v2677_v42  ;;  %v1106_v42 = vld [vmem:[#allocation2 + $0x142] sm:$0xff] }
 0x120   : > { %3463 = vst [vmem:[#allocation100_spill] sm:$0xff] %v2680_v38  ;;  %v1322_v38 = vld [vmem:[#allocation2 + $0x3c] sm:$0xff] }
 0x121   : > { %3464 = vst [vmem:[#allocation101_spill] sm:$0xff] %v2683_v15  ;;  %v2740_v15 = vmul.f32 %v2247_v40, %v1322_v38 }
 0x122   : > { %3465 = vst [vmem:[#allocation102_spill] sm:$0xff] %v2686_v33  ;;  %v2717_v33 = vmul.f32 %v2225_v27, %v1105_v44 }
 0x123   : > { %3466 = vst [vmem:[#allocation103_spill] sm:$0xff] %v2689_v37  ;;  %v879_v37 = vld [vmem:[#allocation2 + $0x48] sm:$0xff] }
 0x124   : > { %3467 = vst [vmem:[#allocation104_spill] sm:$0xff] %v2692_v29  ;;  %v921_v29 = vmul.f32 %v2195_v16, %v879_v37 }
 0x125   : > { %3468 = vst [vmem:[#allocation105_spill] sm:$0xff] %v2695_v49  ;;  %v688_v49 = vpop.f32.mrf.mxu3 }
 0x126   : > { %3469 = vst [vmem:[#allocation106_spill] sm:$0xff] %v2698_v41  ;;  %v2714_v41 = vmul.f32 %v2220_v26, %v1105_v44  ;;  %v2733_v44 = vmul.f32 %v2220_v26, %v1084_v21 }
 0x127   : > { %3470 = vst [vmem:[#allocation107_spill] sm:$0xff] %v2701_v4  ;;  %v1096_v4 = vld [vmem:[#allocation2 + $0xca] sm:$0xff] }
 0x128   : > { %3471 = vst [vmem:[#allocation108_spill] sm:$0xff] %v2704_v53  ;;  %v2723_v53 = vmul.f32 %v2247_v40, %v1343_v32 }
 0x129   : > { %3472 = vst [vmem:[#allocation109_spill] sm:$0xff] %v2710_v7  ;;  %v592_v7 = vpop.f32.mrf.mxu0 }
 0x12a   : > { %734 = vst.msk [vmem:[#allocation2 + $0xd8] sm:$0xff] %vm706_vm2, %v643_v61  ;;  %v2727_v61 = vmul.f32 %v2265_v47, %v1343_v32  ;;  %v1334_v32 = vld [vmem:[#allocation2 + $0xcc] sm:$0xff] }
 0x12b   : > { %3473 = vst [vmem:[#allocation110_spill] sm:$0xff] %v2714_v41  ;;  %v2730_v41 = vmul.f32 %v2210_v20, %v1084_v21  ;;  %v2749_v21 = vmul.f32 %v2225_v27, %v1114_v6 }
 0x12c   : > { %3474 = vst [vmem:[#allocation111_spill] sm:$0xff] %v2720_v46  ;;  %v2736_v46 = vmul.f32 %v2215_v23, %v1322_v38  ;;  %v2755_v38 = vmul.f32 %v2265_v47, %v1352_v43 }
 0x12d   : > { %3475 = vst [vmem:[#allocation112_spill] sm:$0xff] %v2723_v53  ;;  %v845_v53 = vpop.f32.mrf.mxu1 }
 0x12e   : > { %749 = vst.msk [vmem:[#allocation2 + $0x150] sm:$0xff] %vm706_vm2, %v688_v49  ;;  %v2743_v49 = vmul.f32 %v2220_v26, %v1114_v6  ;;  %v987_v6 = vadd.f32 %v2236_v35, %v921_v29 }
 0x12f   : > { %3476 = vst [vmem:[#allocation113_spill] sm:$0xff] %v2730_v41  ;;  %v951_v41 = vmul.f32 %v2200_v17, %v879_v37  ;;  %v2764_v37 = vmul.f32 %v2225_v27, %v1096_v4 }
 0x130   : > { %3477 = vst [vmem:[#allocation114_spill] sm:$0xff] %v2733_v44 }
 0x131   : > { %3478 = vst [vmem:[#allocation115_spill] sm:$0xff] %v2736_v46  ;;  %v2761_v46 = vmul.f32 %v2220_v26, %v1096_v4  ;;  %v891_v29 = vld [vmem:[#allocation2 + $0xd8] sm:$0xff]  ;;  %v595_v44 = vpop.f32.mrf.mxu0 }
 0x132   : > { %717 = vst.msk [vmem:[#allocation2 + $0x50] sm:$0xff] %vm706_vm2, %v592_v7  ;;  %v2752_v7 = vmul.f32 %v2247_v40, %v1352_v43  ;;  %v2772_v43 = vmul.f32 %v2247_v40, %v1334_v32 }
 0x133   : > { %3479 = vst [vmem:[#allocation116_spill] sm:$0xff] %v2740_v15  ;;  %v2758_v15 = vmul.f32 %v2210_v20, %v1096_v4  ;;  %v2781_v4 = vmul.f32 %v2220_v26, %v1106_v42 }
 0x134   : > { %3480 = vst [vmem:[#allocation117_spill] sm:$0xff] %v2743_v49  ;;  %v1344_v49 = vld [vmem:[#allocation2 + $0x144] sm:$0xff] }
 0x135   : > { %868 = vst.msk [vmem:[#allocation2 + $0x1b8] sm:$0xff] %vm706_vm2, %v845_v53  ;;  %v983_v53 = vadd.f32 %v951_v41, %v2428_v2  ;;  %v2784_v2 = vmul.f32 %v2225_v27, %v1106_v42  ;;  %v2787_v35 = vmul.f32 %v2215_v23, %v1344_v49  ;;  %v2790_v41 = vmul.f32 %v2265_v47, %v1344_v49  ;;  %v848_v52 = vpop.f32.mrf.mxu1 }
 0x136   : > { %3481 = vst [vmem:[#allocation118_spill] sm:$0xff] %v2749_v21  ;;  %v2769_v21 = vmul.f32 %v2215_v23, %v1334_v32 }
 0x137   : > { %3482 = vst [vmem:[#allocation119_spill] sm:$0xff] %v2752_v7  ;;  %v2778_v7 = vmul.f32 %v2210_v20, %v1106_v42  ;;  %v691_v42 = vpop.f32.mrf.mxu3 }
 0x138   : > { %3483 = vst [vmem:[#allocation120_spill] sm:$0xff] %v2755_v38  ;;  %v2775_v38 = vmul.f32 %v2265_v47, %v1334_v32  ;;  %v1049_v32 = vadd.f32 %v2239_v36, %v983_v53  ;;  %v1053_v36 = vadd.f32 %v2441_v39, %v987_v6 }
 0x139   : > { %3484 = vst [vmem:[#allocation121_spill] sm:$0xff] %v2758_v15  ;;  %v1085_v53 = vld [vmem:[#allocation2 + $0x4a] sm:$0xff] }
 0x13a   : > { %3485 = vst [vmem:[#allocation122_spill] sm:$0xff] %v2761_v46  ;;  %v909_v46 = vld [vmem:[#allocation2 + $0x1b0] sm:$0xff] }
 0x13b   : > { %3486 = vst [vmem:[#allocation123_spill] sm:$0xff] %v2764_v37  ;;  %v2798_v15 = vmul.f32 %v2205_v19, %v909_v46  ;;  %v880_v37 = vld [vmem:[#allocation2 + $0x50] sm:$0xff] }
 0x13c   : > { %3487 = vst [vmem:[#allocation124_spill] sm:$0xff] %v2769_v21  ;;  %v933_v21 = vmul.f32 %v2195_v16, %v891_v29  ;;  %v922_v46 = vmul.f32 %v2195_v16, %v880_v37  ;;  %v952_v6 = vmul.f32 %v2200_v17, %v880_v37 }
 0x13d   : > { %3488 = vst [vmem:[#allocation125_spill] sm:$0xff] %v2772_v43  ;;  %v646_v43 = vpop.f32.mrf.mxu2 }
 0x13e   : > { %3489 = vst [vmem:[#allocation126_spill] sm:$0xff] %v2775_v38  ;;  %v1025_v38 = vmul.f32 %v2205_v19, %v891_v29  ;;  %v999_v9 = vadd.f32 %v2260_v45, %v933_v21  ;;  %v1115_v45 = vld [vmem:[#allocation2 + $0x1b2] sm:$0xff]  ;;  %v2827_v37 = vadd.f32 %v2284_v54, %v922_v46 }
 0x13f   : > { %3490 = vst [vmem:[#allocation127_spill] sm:$0xff] %v2778_v7  ;;  %v963_v7 = vmul.f32 %v2200_v17, %v891_v29 }
 0x140   : > { %3491 = vst [vmem:[#allocation128_spill] sm:$0xff] %v2781_v4  ;;  %v901_v4 = vld [vmem:[#allocation2 + $0x150] sm:$0xff]  ;;  %v1057_v34 = vadd.f32 %v1025_v38, %v2454_v11  ;;  %v910_v38 = vld [vmem:[#allocation2 + $0x1b8] sm:$0xff]  ;;  %v1065_v54 = vadd.f32 %v2627_v24, %v999_v9 }
 0x141   : > { %3492 = vst [vmem:[#allocation129_spill] sm:$0xff] %v2787_v35  ;;  %v943_v49 = vmul.f32 %v2195_v16, %v901_v4  ;;  %v973_v35 = vmul.f32 %v2200_v17, %v901_v4  ;;  %v995_v29 = vadd.f32 %v963_v7, %v2437_v28  ;;  %v1155_v7 = vadd.f32 %v2460_v12, %v1049_v32 }
 0x142   : > { %3493 = vst [vmem:[#allocation130_spill] sm:$0xff] %v2790_v41  ;;  %v1323_v41 = vld [vmem:[#allocation2 + $0x4c] sm:$0xff]  ;;  %v2834_v32 = vmul.f32 %v2205_v19, %v910_v38 }
 0x143   : > { %735 = vst.msk [vmem:[#allocation2 + $0xe0] sm:$0xff] %vm706_vm2, %v646_v43  ;;  %v2807_v43 = vmul.f32 %v2205_v19, %v901_v4  ;;  %v1005_v39 = vadd.f32 %v973_v35, %v2444_v13  ;;  %v1061_v28 = vadd.f32 %v2269_v48, %v995_v29  ;;  %v2818_v11 = vadd.f32 %v2431_v10, %v943_v49  ;;  %v694_v29 = vpop.f32.mrf.mxu3 }
 0x144   : > { %750 = vst.msk [vmem:[#allocation2 + $0x158] sm:$0xff] %vm706_vm2, %v691_v42  ;;  %v1127_v42 = vmul.f32 %v2210_v20, %v1085_v53  ;;  %v1163_v13 = vadd.f32 %v2290_v56, %v1057_v34  ;;  %v984_v48 = vadd.f32 %v952_v6, %v2457_v3  ;;  %v1365_v10 = vmul.f32 %v2215_v23, %v1323_v41 }
 0x145   : > { %718 = vst.msk [vmem:[#allocation2 + $0x58] sm:$0xff] %vm706_vm2, %v595_v44  ;;  %v1189_v44 = vmul.f32 %v2220_v26, %v1085_v53  ;;  %v2824_v21 = vadd.f32 %v2434_v14, %v1005_v39  ;;  %v1427_v12 = vmul.f32 %v2247_v40, %v1323_v41  ;;  %v2837_v56 = vmul.f32 %v2225_v27, %v1115_v45  ;;  %v649_v49 = vpop.f32.mrf.mxu2 }
 0x146   : > { %869 = vst.msk [vmem:[#allocation2 + $0x1c0] sm:$0xff] %vm706_vm2, %v848_v52  ;;  %v1159_v52 = vadd.f32 %v1127_v42, %v1053_v36  ;;  %v1353_v36 = vld [vmem:[#allocation2 + $0x1b4] sm:$0xff]  ;;  %v1167_v9 = vadd.f32 %v2492_v8, %v1061_v28 }
 0x147   : > { %v1221_v4 = vadd.f32 %v1189_v44, %v1155_v7  ;;  %736 = vst.msk [vmem:[#allocation2 + $0xe8] sm:$0xff] %vm706_vm2, %v649_v49  ;;  %v598_v44 = vpop.f32.mrf.mxu0  ;;  %v3495_v49 = vld [vmem:[#allocation48_spill] sm:$0xff] }
 0x148   : > { %v1225_v35 = vadd.f32 %v2293_v59, %v1159_v52  ;;  %751 = vst.msk [vmem:[#allocation2 + $0x160] sm:$0xff] %vm706_vm2, %v694_v29 }
 0x149   : > { %v1287_v3 = vadd.f32 %v2296_v60, %v1221_v4  ;;  %v2851_v60 = vadd.f32 %v2287_v55, %v984_v48  ;;  %719 = vst.msk [vmem:[#allocation2 + $0x60] sm:$0xff] %vm706_vm2, %v598_v44  ;;  %v2863_v55 = vld [vmem:[%s3364_s4] ss:$0 sm:$0xff]  ;;  %v851_v48 = vpop.f32.mrf.mxu1  ;;  %v3498_v44 = vld [vmem:[#allocation18_spill] sm:$0xff] }
 0x14a   : > { %v892_v14 = vld [vmem:[#allocation2 + $0xe0] sm:$0xff]  ;;  %v1291_v46 = vadd.f32 %v2498_v5, %v1225_v35  ;;  %v2857_v5 = vmul.f32 %v2265_v47, %v1353_v36  ;;  %870 = vst.msk [vmem:[#allocation2 + $0x1c8] sm:$0xff] %vm706_vm2, %v851_v48 }
 0x14b   : > { %v1097_v34 = vld [vmem:[#allocation2 + $0xda] sm:$0xff]  ;;  %v934_v53 = vmul.f32 %v2195_v16, %v892_v14  ;;  %v964_v41 = vmul.f32 %v2200_v17, %v892_v14  ;;  %v1026_v59 = vmul.f32 %v2205_v19, %v892_v14  ;;  %v1393_v6 = vadd.f32 %v2465_v22, %v1287_v3 }
 0x14c   : > { %v1139_v39 = vmul.f32 %v2210_v20, %v1097_v34  ;;  %v1201_v24 = vmul.f32 %v2220_v26, %v1097_v34  ;;  %v1397_v38 = vadd.f32 %v1365_v10, %v1291_v46  ;;  %v1335_v28 = vld [vmem:[#allocation2 + $0xdc] sm:$0xff] }
 0x14d   : > { %v996_v42 = vadd.f32 %v964_v41, %v2486_v58  ;;  %v1058_v7 = vadd.f32 %v1026_v59, %v2501_v57  ;;  %v1459_v52 = vadd.f32 %v1427_v12, %v1393_v6  ;;  %v2866_v22 = vadd.f32 %v2339_v18, %v934_v53  ;;  %v902_v14 = vld [vmem:[#allocation2 + $0x158] sm:$0xff]  ;;  %v3496_v36 = vld [vmem:[#allocation7_spill] sm:$0xff]  ;;  %v652_v41 = vpop.f32.mrf.mxu2  ;;  %v697_v59 = vpop.f32.mrf.mxu3 }
 0x14e   : > { %v1171_v45 = vadd.f32 %v1139_v39, %v1065_v54  ;;  %v1233_v8 = vadd.f32 %v1201_v24, %v1167_v9  ;;  %v1229_v58 = vadd.f32 %v2495_v50, %v1163_v13  ;;  %v1263_v57 = vmul.f32 %v2225_v27, %v1097_v34  ;;  %737 = vst.msk [vmem:[#allocation2 + $0xf0] sm:$0xff] %vm706_vm2, %v652_v41  ;;  %v3497_v24 = vld [vmem:[#allocation49_spill] sm:$0xff] }
 0x14f   : > { %v1463_v4 = vadd.f32 %v2302_v62, %v1397_v38  ;;  %v2872_v10 = vadd.f32 %v2343_v25, %v996_v42  ;;  %v1525_v18 = vadd.f32 %v2305_v0, %v1459_v52  ;;  %v2879_v54 = vadd.f32 %v2372_v63, %v1058_v7  ;;  %v3494_v62 = vld [vmem:[#allocation50_spill] sm:$0xff]  ;;  %752 = vst.msk [vmem:[#allocation2 + $0x168] sm:$0xff] %vm706_vm2, %v697_v59 }
 0x150   : > { %v1237_v12 = vadd.f32 %v2349_v30, %v1171_v45  ;;  %v1299_v35 = vadd.f32 %v2352_v31, %v1233_v8  ;;  %v1295_v50 = vadd.f32 %v1263_v57, %v1229_v58  ;;  %v1377_v13 = vmul.f32 %v2215_v23, %v1335_v28  ;;  %v1107_v42 = vld [vmem:[#allocation2 + $0x152] sm:$0xff]  ;;  %v3499_v45 = vld [vmem:[#allocation19_spill] sm:$0xff] }
 0x151   : > { %v1529_v34 = vadd.f32 %v3494_v62, %v1463_v4  ;;  %v1439_v31 = vmul.f32 %v2247_v40, %v1335_v28  ;;  %v1561_v3 = vadd.f32 %v2863_v55, %v1525_v18  ;;  %v1501_v0 = vmul.f32 %v2265_v47, %v1335_v28  ;;  %v3500_v58 = vld [vmem:[#allocation51_spill] sm:$0xff]  ;;  %v3501_v18 = vld [vmem:[#allocation41_spill] sm:$0xff] }
 0x152   : > { %v1303_v25 = vadd.f32 %v2717_v33, %v1237_v12  ;;  %v1405_v30 = vadd.f32 %v3495_v49, %v1299_v35  ;;  %v1401_v53 = vadd.f32 %v3496_v36, %v1295_v50  ;;  %v974_v63 = vmul.f32 %v2200_v17, %v902_v14  ;;  %v1086_v36 = vld [vmem:[#allocation2 + $0x52] sm:$0xff] }
 0x153   : > { %v1565_v29 = vadd.f32 %v2863_v55, %v1529_v34  ;;  %v944_v33 = vmul.f32 %v2195_v16, %v902_v14  ;;  %vm1593_vm3 = vcmp.gt.f32.partialorder %v1561_v3, 0.0  ;;  %v1625_v9 = vmul.f32 0.01, %v1561_v3  ;;  %v601_v16 = vpop.f32.mrf.mxu0 }
 0x154   : > { %v1409_v46 = vadd.f32 %v1377_v13, %v1303_v25  ;;  %v1471_v39 = vadd.f32 %v1439_v31, %v1405_v30  ;;  %v1467_v17 = vadd.f32 %v3497_v24, %v1401_v53  ;;  %v2901_v6 = vmul.f32 %v2205_v19, %v902_v14  ;;  %720 = vst.msk [vmem:[#allocation2 + $0x68] sm:$0xff] %vm706_vm2, %v601_v16  ;;  %v3502_v13 = vld [vmem:[#allocation54_spill] sm:$0xff]  ;;  %v3506_v16 = vld [vmem:[#allocation47_spill] sm:$0xff] }
 0x155   : > { %vm1597_vm4 = vcmp.gt.f32.partialorder %v1565_v29, 0.0  ;;  %v1629_v7 = vmul.f32 0.01, %v1565_v29  ;;  %v1657_v28 = vsel %vm1593_vm3, %v1561_v3, %v1625_v9  ;;  %v1006_v57 = vadd.f32 %v974_v63, %v3500_v58  ;;  %v1345_v25 = vld [vmem:[#allocation2 + $0x154] sm:$0xff]  ;;  %v854_v9 = vpop.f32.mrf.mxu1 }
 0x156   : > { %v1475_v38 = vadd.f32 %v3498_v44, %v1409_v46  ;;  %v1537_v8 = vadd.f32 %v3499_v45, %v1471_v39  ;;  %v1533_v52 = vadd.f32 %v1501_v0, %v1467_v17  ;;  %v1075_v19 = vadd.f32 %v2798_v15, %v2818_v11  ;;  %1689 = vst.msk [vmem:[%s2897_s10 + $0x10] sm:$0xff] %vm706_vm2, %v1657_v28  ;;  %v3503_v30 = vld [vmem:[#allocation42_spill] sm:$0xff]  ;;  %v3504_v0 = vld [vmem:[#allocation43_spill] sm:$0xff] }
 0x157   : > { %v1661_v48 = vsel %vm1597_vm4, %v1565_v29, %v1629_v7  ;;  %v1149_v35 = vmul.f32 %v2210_v20, %v1107_v42  ;;  %v2919_v50 = vadd.f32 %v3501_v18, %v944_v33  ;;  %v1177_v62 = vadd.f32 %v3502_v13, %v2824_v21  ;;  %v3505_v29 = vld [vmem:[#allocation44_spill] sm:$0xff]  ;;  %v1324_v33 = vld [vmem:[#allocation2 + $0x54] sm:$0xff]  ;;  %871 = vst.msk [vmem:[#allocation2 + $0x1d0] sm:$0xff] %vm706_vm2, %v854_v9 }
 0x158   : > { %v1541_v4 = vadd.f32 %v2727_v61, %v1475_v38  ;;  %v1573_v12 = vadd.f32 %v2863_v55, %v1537_v8  ;;  %1693 = vst.msk [vmem:[%s2897_s10 + $0x30] sm:$0xff] %vm706_vm2, %v1661_v48  ;;  %v1569_v14 = vadd.f32 %v2863_v55, %v1533_v52  ;;  %v1211_v15 = vmul.f32 %v2220_v26, %v1107_v42  ;;  %v1098_v52 = vld [vmem:[#allocation2 + $0xe2] sm:$0xff] }
 0x159   : > { %v1181_v34 = vadd.f32 %v1149_v35, %v1075_v19  ;;  %v2926_v31 = vadd.f32 %v3503_v30, %v1006_v57  ;;  %v2932_v59 = vmul.f32 %v2225_v27, %v1107_v42  ;;  %v1387_v39 = vmul.f32 %v2215_v23, %v1345_v25  ;;  %v3507_v42 = vld [vmem:[#allocation57_spill] sm:$0xff]  ;;  %v655_v19 = vpop.f32.mrf.mxu2 }
 0x15a   : > { %v1577_v11 = vadd.f32 %v2863_v55, %v1541_v4  ;;  %vm1605_vm5 = vcmp.gt.f32.partialorder %v1573_v12, 0.0  ;;  %v1637_v61 = vmul.f32 0.01, %v1573_v12  ;;  %vm1601_vm6 = vcmp.gt.f32.partialorder %v1569_v14, 0.0  ;;  %738 = vst.msk [vmem:[#allocation2 + $0xf8] sm:$0xff] %vm706_vm2, %v655_v19  ;;  %v3522_v19 = vld [vmem:[#allocation71_spill] sm:$0xff] }
 0x15b   : > { %v1633_v49 = vmul.f32 0.01, %v1569_v14  ;;  %v1243_v3 = vadd.f32 %v1211_v15, %v1177_v62  ;;  %v1247_v63 = vadd.f32 %v3504_v0, %v1181_v34  ;;  %v1054_v7 = vadd.f32 %v3506_v16, %v2827_v37  ;;  %v3510_v62 = vld [vmem:[#allocation66_spill] sm:$0xff] }
 0x15c   : > { %vm1609_vm7 = vcmp.gt.f32.partialorder %v1577_v11, 0.0  ;;  %v1641_v21 = vmul.f32 0.01, %v1577_v11  ;;  %v1669_v53 = vsel %vm1605_vm5, %v1573_v12, %v1637_v61  ;;  %v1128_v44 = vmul.f32 %v2210_v20, %v1086_v36  ;;  %v3511_v61 = vld [vmem:[#allocation46_spill] sm:$0xff] }
 0x15d   : > { %v1665_v41 = vsel %vm1601_vm6, %v1569_v14, %v1633_v49  ;;  %1701 = vst.msk [vmem:[%s2897_s10 + $0x70] sm:$0xff] %vm706_vm2, %v1669_v53  ;;  %v1309_v46 = vadd.f32 %v3505_v29, %v1243_v3  ;;  %v1313_v17 = vadd.f32 %v2837_v56, %v1247_v63  ;;  %v1449_v45 = vmul.f32 %v2247_v40, %v1345_v25  ;;  %v3509_v14 = vld [vmem:[#allocation22_spill] sm:$0xff] }
 0x15e   : > { %v1673_v24 = vsel %vm1609_vm7, %v1577_v11, %v1641_v21  ;;  %1697 = vst.msk [vmem:[%s2897_s10 + $0x50] sm:$0xff] %vm706_vm2, %v1665_v41  ;;  %v1156_v8 = vadd.f32 %v2543_v51, %v2851_v60  ;;  %v1190_v28 = vmul.f32 %v2220_v26, %v1086_v36  ;;  %v2950_v56 = vmul.f32 %v2265_v47, %v1345_v25  ;;  %v3508_v60 = vld [vmem:[#allocation45_spill] sm:$0xff]  ;;  %v1336_v11 = vld [vmem:[#allocation2 + $0xe4] sm:$0xff] }
 0x15f   : > { %1705 = vst.msk [vmem:[%s2897_s10 + $0x90] sm:$0xff] %vm706_vm2, %v1673_v24  ;;  %v1415_v38 = vadd.f32 %v3507_v42, %v1309_v46  ;;  %v1419_v58 = vadd.f32 %v1387_v39, %v1313_v17  ;;  %v1160_v57 = vadd.f32 %v1128_v44, %v1054_v7  ;;  %v1366_v37 = vmul.f32 %v2215_v23, %v1324_v33  ;;  %v3512_v25 = vld [vmem:[#allocation23_spill] sm:$0xff]  ;;  %v3514_v36 = vld [vmem:[#allocation68_spill] sm:$0xff]  ;;  %v700_v46 = vpop.f32.mrf.mxu3  ;;  %v3518_v7 = vld [vmem:[#allocation25_spill] sm:$0xff] }
 0x160   : > { %v1222_v4 = vadd.f32 %v1190_v28, %v1156_v8  ;;  %v1428_v12 = vmul.f32 %v2247_v40, %v1324_v33  ;;  %v1066_v51 = vadd.f32 %v2707_v1, %v2866_v22  ;;  %v1140_v13 = vmul.f32 %v2210_v20, %v1098_v52  ;;  %v3513_v1 = vld [vmem:[#allocation67_spill] sm:$0xff]  ;;  %v3516_v33 = vld [vmem:[#allocation34_spill] sm:$0xff]  ;;  %753 = vst.msk [vmem:[#allocation2 + $0x170] sm:$0xff] %vm706_vm2, %v700_v46  ;;  %v3520_v8 = vld [vmem:[#allocation24_spill] sm:$0xff] }
 0x161   : > { %v1481_v48 = vadd.f32 %v1449_v45, %v1415_v38  ;;  %v1485_v35 = vadd.f32 %v3508_v60, %v1419_v58  ;;  %v1226_v18 = vadd.f32 %v3509_v14, %v1160_v57  ;;  %v1168_v15 = vadd.f32 %v3510_v62, %v2872_v10  ;;  %v3515_v10 = vld [vmem:[#allocation60_spill] sm:$0xff]  ;;  %v3517_v24 = vld [vmem:[#allocation35_spill] sm:$0xff]  ;;  %v3519_v38 = vld [vmem:[#allocation26_spill] sm:$0xff] }
 0x162   : > { %v1288_v49 = vadd.f32 %v3512_v25, %v1222_v4  ;;  %v1202_v30 = vmul.f32 %v2220_v26, %v1098_v52  ;;  %v1230_v22 = vadd.f32 %v3513_v1, %v2879_v54  ;;  %v1172_v53 = vadd.f32 %v1140_v13, %v1066_v51  ;;  %v2983_v57 = vld [vmem:[#allocation2 + $0x15a] sm:$0xff]  ;;  %v3524_v62 = vld [vmem:[#allocation37_spill] sm:$0xff] }
 0x163   : > { %v1547_v34 = vadd.f32 %v3511_v61, %v1481_v48  ;;  %v1551_v3 = vadd.f32 %v2857_v5, %v1485_v35  ;;  %v1292_v21 = vadd.f32 %v3514_v36, %v1226_v18  ;;  %v1264_v20 = vmul.f32 %v2225_v27, %v1098_v52  ;;  %v3521_v52 = vld [vmem:[#allocation69_spill] sm:$0xff]  ;;  %v3523_v51 = vld [vmem:[#allocation70_spill] sm:$0xff] }
 0x164   : > { %v1394_v63 = vadd.f32 %v3515_v10, %v1288_v49  ;;  %v1234_v41 = vadd.f32 %v1202_v30, %v1168_v15  ;;  %v1378_v29 = vmul.f32 %v2215_v23, %v1336_v11  ;;  %v1238_v54 = vadd.f32 %v3516_v33, %v1172_v53  ;;  %v3526_v49 = vld [vmem:[#allocation38_spill] sm:$0xff]  ;;  %v3013_v53 = vld [vmem:[%s3363_s3 + $0x4] ss:$0 sm:$0xff]  ;;  %v3528_v33 = vld [vmem:[#allocation61_spill] sm:$0xff] }
 0x165   : > { %v1583_v0 = vadd.f32 %v2863_v55, %v1547_v34  ;;  %v1587_v26 = vadd.f32 %v2863_v55, %v1551_v3  ;;  %v1398_v39 = vadd.f32 %v1366_v37, %v1292_v21  ;;  %v1296_v9 = vadd.f32 %v1264_v20, %v1230_v22  ;;  %v3527_v1 = vld [vmem:[#allocation130_spill] sm:$0xff] }
 0x166   : > { %v1460_v27 = vadd.f32 %v1428_v12, %v1394_v63  ;;  %v1300_v17 = vadd.f32 %v3517_v24, %v1234_v41  ;;  %v1304_v44 = vadd.f32 %v2784_v2, %v1238_v54  ;;  %v1440_v12 = vmul.f32 %v2247_v40, %v1336_v11  ;;  %v3001_v40 = vld [vmem:[%s3363_s3 + $0x1] ss:$0 sm:$0xff] }
 0x167   : > { %vm1615_vm8 = vcmp.gt.f32.partialorder %v1583_v0, 0.0  ;;  %v1647_v5 = vmul.f32 0.01, %v1583_v0  ;;  %vm1619_vm9 = vcmp.gt.f32.partialorder %v1587_v26, 0.0  ;;  %v1651_v16 = vmul.f32 0.01, %v1587_v26 }
 0x168   : > { %v1464_v23 = vadd.f32 %v3518_v7, %v1398_v39  ;;  %v1526_v45 = vadd.f32 %v3519_v38, %v1460_v27  ;;  %v1402_v28 = vadd.f32 %v3520_v8, %v1296_v9  ;;  %v1406_v58 = vadd.f32 %v3521_v52, %v1300_v17  ;;  %v1354_v46 = vld [vmem:[#allocation2 + $0x1bc] sm:$0xff]  ;;  %v3040_v38 = vld [vmem:[%s3363_s3 + $0x8] ss:$0 sm:$0xff]  ;;  %v3048_v52 = vld [vmem:[%s3363_s3 + $0x5] ss:$0 sm:$0xff] }
 0x169   : > { %v1679_v42 = vsel %vm1615_vm8, %v1583_v0, %v1647_v5  ;;  %v1683_v37 = vsel %vm1619_vm9, %v1587_v26, %v1651_v16  ;;  %v1410_v4 = vadd.f32 %v1378_v29, %v1304_v44  ;;  %v1502_v35 = vmul.f32 %v2265_v47, %v1336_v11  ;;  %v1116_v47 = vld [vmem:[#allocation2 + $0x1ba] sm:$0xff]  ;;  %v3022_v0 = vld [vmem:[%s3363_s3 + $0x7] ss:$0 sm:$0xff] }
 0x16a   : > { %1711 = vst.msk [vmem:[%s2897_s10 + $0xc0] sm:$0xff] %vm706_vm2, %v1679_v42  ;;  %v1530_v48 = vadd.f32 %v3522_v19, %v1464_v23  ;;  %v1562_v2 = vadd.f32 %v2863_v55, %v1526_v45  ;;  %v1468_v60 = vadd.f32 %v3523_v51, %v1402_v28  ;;  %v1076_v14 = vadd.f32 %v2834_v32, %v2919_v50  ;;  %v3525_v32 = vld [vmem:[#allocation72_spill] sm:$0xff]  ;;  %v1346_v29 = vld [vmem:[#allocation2 + $0x15c] sm:$0xff]  ;;  %v893_v42 = vld [vmem:[#allocation2 + $0xf0] sm:$0xff] }
 0x16b   : > { %1715 = vst.msk [vmem:[%s2897_s10 + $0xe0] sm:$0xff] %vm706_vm2, %v1683_v37  ;;  %v1472_v13 = vadd.f32 %v1440_v12, %v1406_v58  ;;  %v1476_v15 = vadd.f32 %v3524_v62, %v1410_v4  ;;  %v1150_v61 = vmul.f32 %v3001_v40, %v2983_v57  ;;  %v1178_v50 = vadd.f32 %v3525_v32, %v2926_v31  ;;  %v881_v9 = vld [vmem:[#allocation2 + $0x60] sm:$0xff]  ;;  %v3529_v17 = vld [vmem:[#allocation62_spill] sm:$0xff]  ;;  %v604_v37 = vpop.f32.mrf.mxu0 }
 0x16c   : > { %v1566_v18 = vadd.f32 %v2863_v55, %v1530_v48  ;;  %vm1594_vm10 = vcmp.gt.f32.partialorder %v1562_v2, 0.0  ;;  %v1626_v34 = vmul.f32 0.01, %v1562_v2  ;;  %v1534_v11 = vadd.f32 %v1502_v35, %v1468_v60  ;;  %v3034_v23 = vld [vmem:[%s3363_s3 + $0x2] ss:$0 sm:$0xff]  ;;  %v911_v35 = vld [vmem:[#allocation2 + $0x1c8] sm:$0xff] }
 0x16d   : > { %v1538_v30 = vadd.f32 %v3526_v49, %v1472_v13  ;;  %v1542_v22 = vadd.f32 %v3527_v1, %v1476_v15  ;;  %v1182_v21 = vadd.f32 %v1150_v61, %v1076_v14  ;;  %v1212_v20 = vmul.f32 %v3013_v53, %v2983_v57  ;;  %v3530_v19 = vld [vmem:[#allocation75_spill] sm:$0xff]  ;;  %v903_v61 = vld [vmem:[#allocation2 + $0x168] sm:$0xff]  ;;  %721 = vst.msk [vmem:[#allocation2 + $0x70] sm:$0xff] %vm706_vm2, %v604_v37  ;;  %v3534_v1 = vld [vmem:[#allocation82_spill] sm:$0xff] }
 0x16e   : > { %vm1598_vm11 = vcmp.gt.f32.partialorder %v1566_v18, 0.0  ;;  %v1630_v25 = vmul.f32 0.01, %v1566_v18  ;;  %v1658_v3 = vsel %vm1594_vm10, %v1562_v2, %v1626_v34  ;;  %v1570_v36 = vadd.f32 %v2863_v55, %v1534_v11  ;;  %v3057_v12 = vld [vmem:[%s3363_s3] ss:$0 sm:$0xff] }
 0x16f   : > { %1690 = vst.msk [vmem:[%s2897_s10 + $0x18] sm:$0xff] %vm706_vm2, %v1658_v3  ;;  %v1282_v10 = vmul.f32 %v3022_v0, %v1116_v47  ;;  %v1574_v63 = vadd.f32 %v2863_v55, %v1538_v30  ;;  %v1578_v41 = vadd.f32 %v2863_v55, %v1542_v22  ;;  %v1244_v39 = vadd.f32 %v1212_v20, %v1178_v50  ;;  %v3063_v51 = vld [vmem:[%s3363_s3 + $0x3] ss:$0 sm:$0xff] }
 0x170   : > { %v1662_v31 = vsel %vm1598_vm11, %v1566_v18, %v1630_v25  ;;  %vm1602_vm12 = vcmp.gt.f32.partialorder %v1570_v36, 0.0  ;;  %v1634_v26 = vmul.f32 0.01, %v1570_v36  ;;  %v1248_v54 = vadd.f32 %v3528_v33, %v1182_v21  ;;  %v3075_v18 = vld [vmem:[%s3363_s3 + $0x6] ss:$0 sm:$0xff]  ;;  %v3535_v21 = vld [vmem:[#allocation65_spill] sm:$0xff] }
 0x171   : > { %1694 = vst.msk [vmem:[%s2897_s10 + $0x38] sm:$0xff] %vm706_vm2, %v1662_v31  ;;  %vm1606_vm13 = vcmp.gt.f32.partialorder %v1574_v63, 0.0  ;;  %vm1610_vm14 = vcmp.gt.f32.partialorder %v1578_v41, 0.0  ;;  %v1638_v5 = vmul.f32 0.01, %v1574_v63  ;;  %v1310_v16 = vadd.f32 %v3529_v17, %v1244_v39  ;;  %v3531_v47 = vld [vmem:[#allocation63_spill] sm:$0xff] }
 0x172   : > { %v1642_v27 = vmul.f32 0.01, %v1578_v41  ;;  %v1666_v24 = vsel %vm1602_vm12, %v1570_v36, %v1634_v26  ;;  %v1314_v7 = vadd.f32 %v1282_v10, %v1248_v54  ;;  %v1388_v44 = vmul.f32 %v3034_v23, %v1346_v29  ;;  %v3533_v25 = vld [vmem:[#allocation79_spill] sm:$0xff]  ;;  %v857_v36 = vpop.f32.mrf.mxu1  ;;  %v3539_v54 = vld [vmem:[#allocation85_spill] sm:$0xff] }
 0x173   : > { %v1520_v45 = vmul.f32 %v3040_v38, %v1354_v46  ;;  %v1670_v8 = vsel %vm1606_vm13, %v1574_v63, %v1638_v5  ;;  %1698 = vst.msk [vmem:[%s2897_s10 + $0x58] sm:$0xff] %vm706_vm2, %v1666_v24  ;;  %v1450_v58 = vmul.f32 %v3048_v52, %v1346_v29  ;;  %v1416_v48 = vadd.f32 %v3530_v19, %v1310_v16  ;;  %v3536_v10 = vld [vmem:[#allocation3_spill] sm:$0xff]  ;;  %v3537_v46 = vld [vmem:[#allocation4_spill] sm:$0xff]  ;;  %v3540_v17 = vld [vmem:[#allocation5_spill] sm:$0xff] }
 0x174   : > { %v1674_v28 = vsel %vm1610_vm14, %v1578_v41, %v1642_v27  ;;  %1702 = vst.msk [vmem:[%s2897_s10 + $0x78] sm:$0xff] %vm706_vm2, %v1670_v8  ;;  %v1420_v4 = vadd.f32 %v1388_v44, %v1314_v7  ;;  %v923_v2 = vmul.f32 %v3057_v12, %v881_v9  ;;  %v953_v60 = vmul.f32 %v3063_v51, %v881_v9  ;;  %v3538_v39 = vld [vmem:[#allocation39_spill] sm:$0xff]  ;;  %v3541_v44 = vld [vmem:[#allocation40_spill] sm:$0xff] }
 0x175   : > { %1706 = vst.msk [vmem:[%s2897_s10 + $0x98] sm:$0xff] %vm706_vm2, %v1674_v28  ;;  %v3070_v14 = vmul.f32 %v3022_v0, %v2983_v57  ;;  %v1015_v13 = vmul.f32 %v3075_v18, %v881_v9  ;;  %v935_v62 = vmul.f32 %v3057_v12, %v893_v42  ;;  %v965_v15 = vmul.f32 %v3063_v51, %v893_v42  ;;  %v3532_v57 = vld [vmem:[#allocation78_spill] sm:$0xff]  ;;  %v3543_v28 = vld [vmem:[#allocation80_spill] sm:$0xff] }
 0x176   : > { %v1482_v34 = vadd.f32 %v1450_v58, %v1416_v48  ;;  %v1486_v11 = vadd.f32 %v3531_v47, %v1420_v4  ;;  %v3082_v32 = vmul.f32 %v3040_v38, %v1346_v29  ;;  %v985_v50 = vadd.f32 %v953_v60, %v3532_v57  ;;  %v882_v29 = vld [vmem:[#allocation2 + $0x68] sm:$0xff]  ;;  %872 = vst.msk [vmem:[#allocation2 + $0x1d8] sm:$0xff] %vm706_vm2, %v857_v36  ;;  %v658_v48 = vpop.f32.mrf.mxu2  ;;  %v3544_v60 = vld [vmem:[#allocation10_spill] sm:$0xff]  ;;  %v3547_v57 = vld [vmem:[#allocation81_spill] sm:$0xff] }
 0x177   : > { %v1047_v49 = vadd.f32 %v1015_v13, %v3533_v25  ;;  %v3088_v30 = vmul.f32 %v3075_v18, %v911_v35  ;;  %v997_v22 = vadd.f32 %v965_v15, %v3534_v1  ;;  %v1027_v3 = vmul.f32 %v3075_v18, %v893_v42  ;;  %v1087_v19 = vld [vmem:[#allocation2 + $0x62] sm:$0xff]  ;;  %739 = vst.msk [vmem:[#allocation2 + $0x100] sm:$0xff] %vm706_vm2, %v658_v48 }
 0x178   : > { %v1548_v20 = vadd.f32 %v3535_v21, %v1482_v34  ;;  %v1552_v31 = vadd.f32 %v1520_v45, %v1486_v11  ;;  %v989_v63 = vadd.f32 %v3536_v10, %v923_v2  ;;  %v945_v41 = vmul.f32 %v3057_v12, %v903_v61  ;;  %v3542_v45 = vld [vmem:[#allocation84_spill] sm:$0xff]  ;;  %v3551_v10 = vld [vmem:[#allocation91_spill] sm:$0xff] }
 0x179   : > { %v1051_v26 = vadd.f32 %v3537_v46, %v985_v50  ;;  %v1001_v33 = vadd.f32 %v3538_v39, %v935_v62  ;;  %v1059_v9 = vadd.f32 %v1027_v3, %v3539_v54  ;;  %v975_v5 = vmul.f32 %v3063_v51, %v903_v61  ;;  %v3545_v13 = vld [vmem:[#allocation64_spill] sm:$0xff]  ;;  %v3549_v3 = vld [vmem:[#allocation83_spill] sm:$0xff] }
 0x17a   : > { %v1584_v27 = vadd.f32 %v2863_v55, %v1548_v20  ;;  %v1588_v24 = vadd.f32 %v2863_v55, %v1552_v31  ;;  %v1153_v16 = vadd.f32 %v3540_v17, %v1047_v49  ;;  %v1037_v7 = vmul.f32 %v3075_v18, %v903_v61  ;;  %v3546_v61 = vld [vmem:[#allocation86_spill] sm:$0xff]  ;;  %v1325_v49 = vld [vmem:[#allocation2 + $0x64] sm:$0xff] }
 0x17b   : > { %v1063_v42 = vadd.f32 %v3541_v44, %v997_v22  ;;  %v1007_v8 = vadd.f32 %v975_v5, %v3542_v45  ;;  %v3107_v58 = vadd.f32 %v3543_v28, %v945_v41  ;;  %v954_v37 = vmul.f32 %v3063_v51, %v882_v29  ;;  %v3548_v1 = vld [vmem:[#allocation16_spill] sm:$0xff]  ;;  %v3550_v20 = vld [vmem:[#allocation87_spill] sm:$0xff]  ;;  %v894_v5 = vld [vmem:[#allocation2 + $0xf8] sm:$0xff] }
 0x17c   : > { %vm1616_vm15 = vcmp.gt.f32.partialorder %v1584_v27, 0.0  ;;  %vm1620_vm0 = vcmp.gt.f32.partialorder %v1588_v24, 0.0  ;;  %v1648_v4 = vmul.f32 0.01, %v1584_v27  ;;  %v1652_v2 = vmul.f32 0.01, %v1588_v24 }
 0x17d   : > { %v3111_v35 = vadd.f32 %v3544_v60, %v1059_v9  ;;  %v1069_v62 = vadd.f32 %v1037_v7, %v3545_v13  ;;  %v924_v15 = vmul.f32 %v3057_v12, %v882_v29  ;;  %v986_v34 = vadd.f32 %v954_v37, %v3546_v61  ;;  %v3552_v39 = vld [vmem:[#allocation88_spill] sm:$0xff]  ;;  %v912_v9 = vld [vmem:[#allocation2 + $0x1d0] sm:$0xff] }
 0x17e   : > { %v1680_v47 = vsel %vm1616_vm15, %v1584_v27, %v1648_v4  ;;  %v1684_v11 = vsel %vm1620_vm0, %v1588_v24, %v1652_v2  ;;  %v3118_v50 = vadd.f32 %v3547_v57, %v1007_v8  ;;  %v1016_v25 = vmul.f32 %v3075_v18, %v882_v29  ;;  %v3553_v27 = vld [vmem:[#allocation8_spill] sm:$0xff]  ;;  %v1099_v37 = vld [vmem:[#allocation2 + $0xf2] sm:$0xff]  ;;  %v3556_v4 = vld [vmem:[#allocation11_spill] sm:$0xff] }
 0x17f   : > { %1712 = vst.msk [vmem:[%s2897_s10 + $0xc8] sm:$0xff] %vm706_vm2, %v1680_v47  ;;  %v3124_v22 = vadd.f32 %v3548_v1, %v1069_v62  ;;  %v1055_v36 = vadd.f32 %v3549_v3, %v989_v63  ;;  %v1129_v21 = vmul.f32 %v3001_v40, %v1087_v19  ;;  %v1157_v31 = vadd.f32 %v3550_v20, %v1051_v26  ;;  %v3554_v63 = vld [vmem:[#allocation9_spill] sm:$0xff]  ;;  %v3557_v61 = vld [vmem:[#allocation12_spill] sm:$0xff]  ;;  %v3558_v47 = vld [vmem:[#allocation6_spill] sm:$0xff] }
 0x180   : > { %1716 = vst.msk [vmem:[%s2897_s10 + $0xe8] sm:$0xff] %vm706_vm2, %v1684_v11  ;;  %v1048_v41 = vadd.f32 %v1016_v25, %v3551_v10  ;;  %v1191_v46 = vmul.f32 %v3013_v53, %v1087_v19  ;;  %v1219_v29 = vadd.f32 %v3552_v39, %v1153_v16  ;;  %v1253_v54 = vmul.f32 %v3022_v0, %v1087_v19  ;;  %v1117_v16 = vld [vmem:[#allocation2 + $0x1ca] sm:$0xff]  ;;  %v3561_v10 = vld [vmem:[#allocation90_spill] sm:$0xff]  ;;  %v3562_v39 = vld [vmem:[#allocation99_spill] sm:$0xff] }
 0x181   : > { %v3136_v24 = vadd.f32 %v3553_v27, %v924_v15  ;;  %v3139_v17 = vadd.f32 %v3554_v63, %v986_v34  ;;  %v1161_v7 = vadd.f32 %v1129_v21, %v1055_v36  ;;  %v1367_v26 = vmul.f32 %v3034_v23, %v1325_v49  ;;  %v3555_v19 = vld [vmem:[#allocation20_spill] sm:$0xff]  ;;  %v703_v15 = vpop.f32.mrf.mxu3  ;;  %v3560_v20 = vld [vmem:[#allocation89_spill] sm:$0xff] }
 0x182   : > { %v1223_v44 = vadd.f32 %v1191_v46, %v1157_v31  ;;  %v1285_v45 = vadd.f32 %v1253_v54, %v1219_v29  ;;  %v1429_v8 = vmul.f32 %v3048_v52, %v1325_v49  ;;  %v1491_v28 = vmul.f32 %v3040_v38, %v1325_v49  ;;  %v1355_v13 = vld [vmem:[#allocation2 + $0x1cc] sm:$0xff]  ;;  %754 = vst.msk [vmem:[#allocation2 + $0x178] sm:$0xff] %vm706_vm2, %v703_v15 }
 0x183   : > { %v3145_v48 = vadd.f32 %v3555_v19, %v1048_v41  ;;  %v1227_v2 = vadd.f32 %v3556_v4, %v1161_v7  ;;  %v3149_v60 = vmul.f32 %v3075_v18, %v912_v9  ;;  %v936_v62 = vmul.f32 %v3057_v12, %v894_v5  ;;  %v3559_v49 = vld [vmem:[#allocation104_spill] sm:$0xff]  ;;  %v3563_v9 = vld [vmem:[#allocation101_spill] sm:$0xff]  ;;  %v3566_v4 = vld [vmem:[#allocation14_spill] sm:$0xff] }
 0x184   : > { %v1289_v34 = vadd.f32 %v3557_v61, %v1223_v44  ;;  %v1391_v11 = vadd.f32 %v3558_v47, %v1285_v45  ;;  %v966_v57 = vmul.f32 %v3063_v51, %v894_v5  ;;  %v1028_v25 = vmul.f32 %v3075_v18, %v894_v5  ;;  %v3565_v45 = vld [vmem:[#allocation103_spill] sm:$0xff]  ;;  %v1337_v19 = vld [vmem:[#allocation2 + $0xf4] sm:$0xff] }
 0x185   : > { %v1293_v1 = vadd.f32 %v3559_v49, %v1227_v2  ;;  %v3159_v3 = vmul.f32 %v3022_v0, %v1117_v16  ;;  %v1067_v36 = vadd.f32 %v2807_v43, %v1001_v33  ;;  %v1141_v21 = vmul.f32 %v3001_v40, %v1099_v37  ;;  %v3564_v43 = vld [vmem:[#allocation52_spill] sm:$0xff] }
 0x186   : > { %v1395_v31 = vadd.f32 %v3560_v20, %v1289_v34  ;;  %v1457_v41 = vadd.f32 %v3561_v10, %v1391_v11  ;;  %v3166_v46 = vmul.f32 %v3040_v38, %v1355_v13  ;;  %v998_v29 = vadd.f32 %v966_v57, %v3562_v39  ;;  %v3567_v13 = vld [vmem:[#allocation53_spill] sm:$0xff]  ;;  %v3571_v57 = vld [vmem:[#allocation107_spill] sm:$0xff]  ;;  %v3572_v49 = vld [vmem:[#allocation56_spill] sm:$0xff] }
 0x187   : > { %v1399_v54 = vadd.f32 %v1367_v26, %v1293_v1  ;;  %v1169_v5 = vadd.f32 %v3563_v9, %v1063_v42  ;;  %v1173_v27 = vadd.f32 %v1141_v21, %v1067_v36  ;;  %v1203_v63 = vmul.f32 %v3013_v53, %v1099_v37  ;;  %v3568_v26 = vld [vmem:[#allocation55_spill] sm:$0xff]  ;;  %v3573_v39 = vld [vmem:[#allocation105_spill] sm:$0xff] }
 0x188   : > { %v1461_v7 = vadd.f32 %v1429_v8, %v1395_v31  ;;  %v1523_v44 = vadd.f32 %v1491_v28, %v1457_v41  ;;  %v3172_v33 = vadd.f32 %v3564_v43, %v936_v62  ;;  %v1060_v16 = vadd.f32 %v1028_v25, %v3565_v45  ;;  %v3569_v42 = vld [vmem:[#allocation15_spill] sm:$0xff]  ;;  %v3570_v8 = vld [vmem:[#allocation102_spill] sm:$0xff] }
 0x189   : > { %v1465_v2 = vadd.f32 %v3566_v4, %v1399_v54  ;;  %v3177_v15 = vadd.f32 %v3567_v13, %v998_v29  ;;  %v1235_v61 = vadd.f32 %v1203_v63, %v1169_v5  ;;  %v1239_v34 = vadd.f32 %v3568_v26, %v1173_v27  ;;  %v904_v54 = vld [vmem:[#allocation2 + $0x170] sm:$0xff]  ;;  %v3576_v4 = vld [vmem:[#allocation106_spill] sm:$0xff] }
 0x18a   : > { %v1527_v47 = vadd.f32 %v3569_v42, %v1461_v7  ;;  %v1559_v11 = vadd.f32 %v2863_v55, %v1523_v44  ;;  %v1231_v28 = vadd.f32 %v3570_v8, %v3111_v35  ;;  %v1265_v62 = vmul.f32 %v3022_v0, %v1099_v37  ;;  %v3574_v5 = vld [vmem:[#allocation13_spill] sm:$0xff]  ;;  %v3575_v44 = vld [vmem:[#allocation58_spill] sm:$0xff]  ;;  %v3577_v42 = vld [vmem:[#allocation59_spill] sm:$0xff] }
 0x18b   : > { %v1531_v25 = vadd.f32 %v3571_v57, %v1465_v2  ;;  %v1301_v1 = vadd.f32 %v3572_v49, %v1235_v61  ;;  %v1305_v36 = vadd.f32 %v2932_v59, %v1239_v34  ;;  %v1379_v21 = vmul.f32 %v3034_v23, %v1337_v19  ;;  %v1109_v26 = vld [vmem:[#allocation2 + $0x16a] sm:$0xff] }
 0x18c   : > { %v1563_v20 = vadd.f32 %v2863_v55, %v1527_v47  ;;  %vm1591_vm1 = vcmp.gt.f32.partialorder %v1559_v11, 0.0  ;;  %v1623_v31 = vmul.f32 0.01, %v1559_v11  ;;  %v1297_v10 = vadd.f32 %v1265_v62, %v1231_v28  ;;  %v3578_v28 = vld [vmem:[#allocation27_spill] sm:$0xff] }
 0x18d   : > { %v1567_v41 = vadd.f32 %v2863_v55, %v1531_v25  ;;  %v1407_v35 = vadd.f32 %v3573_v39, %v1301_v1  ;;  %v1411_v29 = vadd.f32 %v1379_v21, %v1305_v36  ;;  %v1441_v37 = vmul.f32 %v3048_v52, %v1337_v19  ;;  %v3579_v25 = vld [vmem:[#allocation108_spill] sm:$0xff]  ;;  %v3580_v36 = vld [vmem:[#allocation94_spill] sm:$0xff] }
 0x18e   : > { %vm1595_vm3 = vcmp.gt.f32.partialorder %v1563_v20, 0.0  ;;  %v1627_v9 = vmul.f32 0.01, %v1563_v20  ;;  %v1655_v59 = vsel %vm1591_vm1, %v1559_v11, %v1623_v31  ;;  %v1403_v27 = vadd.f32 %v3574_v5, %v1297_v10  ;;  %v1088_v5 = vld [vmem:[#allocation2 + $0x6a] sm:$0xff] }
 0x18f   : > { %vm1599_vm4 = vcmp.gt.f32.partialorder %v1567_v41, 0.0  ;;  %v1631_v63 = vmul.f32 0.01, %v1567_v41  ;;  %1687 = vst.msk [vmem:[%s2897_s10] sm:$0xff] %vm706_vm2, %v1655_v59  ;;  %v1473_v7 = vadd.f32 %v1441_v37, %v1407_v35  ;;  %v1477_v43 = vadd.f32 %v3575_v44, %v1411_v29  ;;  %v3582_v35 = vld [vmem:[#allocation33_spill] sm:$0xff]  ;;  %v3585_v44 = vld [vmem:[#allocation95_spill] sm:$0xff] }
 0x190   : > { %v1659_v45 = vsel %vm1595_vm3, %v1563_v20, %v1627_v9  ;;  %v1469_v2 = vadd.f32 %v3576_v4, %v1403_v27  ;;  %v1503_v13 = vmul.f32 %v3040_v38, %v1337_v19  ;;  %v976_v61 = vmul.f32 %v3063_v51, %v904_v54  ;;  %v3586_v4 = vld [vmem:[#allocation96_spill] sm:$0xff] }
 0x191   : > { %v1663_v34 = vsel %vm1599_vm4, %v1567_v41, %v1631_v63  ;;  %1691 = vst.msk [vmem:[%s2897_s10 + $0x20] sm:$0xff] %vm706_vm2, %v1659_v45  ;;  %v1539_v47 = vadd.f32 %v3577_v42, %v1473_v7  ;;  %v1543_v11 = vadd.f32 %v2950_v56, %v1477_v43  ;;  %v1038_v8 = vmul.f32 %v3075_v18, %v904_v54  ;;  %v3584_v63 = vld [vmem:[#allocation92_spill] sm:$0xff] }
 0x192   : > { %1695 = vst.msk [vmem:[%s2897_s10 + $0x40] sm:$0xff] %vm706_vm2, %v1663_v34  ;;  %v3208_v62 = vadd.f32 %v3578_v28, %v1060_v16  ;;  %v1535_v57 = vadd.f32 %v1503_v13, %v1469_v2  ;;  %v946_v19 = vmul.f32 %v3057_v12, %v904_v54  ;;  %v1008_v51 = vadd.f32 %v976_v61, %v3579_v25  ;;  %v3581_v16 = vld [vmem:[#allocation109_spill] sm:$0xff]  ;;  %v3587_v61 = vld [vmem:[#allocation100_spill] sm:$0xff]  ;;  %v3589_v28 = vld [vmem:[#allocation111_spill] sm:$0xff] }
 0x193   : > { %v1575_v49 = vadd.f32 %v2863_v55, %v1539_v47  ;;  %v1579_v1 = vadd.f32 %v2863_v55, %v1543_v11  ;;  %v1070_v21 = vadd.f32 %v1038_v8, %v3580_v36  ;;  %v1151_v56 = vmul.f32 %v3001_v40, %v1109_v26  ;;  %v1347_v54 = vld [vmem:[#allocation2 + $0x16c] sm:$0xff]  ;;  %v3590_v25 = vld [vmem:[#allocation114_spill] sm:$0xff] }
 0x194   : > { %v1571_v18 = vadd.f32 %v2863_v55, %v1535_v57  ;;  %v1077_v20 = vadd.f32 %v3088_v30, %v3107_v58  ;;  %v1179_v31 = vadd.f32 %v3581_v16, %v3118_v50  ;;  %v1213_v12 = vmul.f32 %v3013_v53, %v1109_v26  ;;  %v3583_v50 = vld [vmem:[#allocation110_spill] sm:$0xff]  ;;  %v3591_v36 = vld [vmem:[#allocation93_spill] sm:$0xff] }
 0x195   : > { %vm1607_vm5 = vcmp.gt.f32.partialorder %v1575_v49, 0.0  ;;  %vm1611_vm6 = vcmp.gt.f32.partialorder %v1579_v1, 0.0  ;;  %v1639_v10 = vmul.f32 0.01, %v1575_v49  ;;  %v1643_v41 = vmul.f32 0.01, %v1579_v1 }
 0x196   : > { %vm1603_vm7 = vcmp.gt.f32.partialorder %v1571_v18, 0.0  ;;  %v1635_v39 = vmul.f32 0.01, %v1571_v18  ;;  %v3223_v29 = vadd.f32 %v3582_v35, %v1070_v21  ;;  %v1183_v37 = vadd.f32 %v1151_v56, %v1077_v20  ;;  %v3592_v56 = vld [vmem:[#allocation17_spill] sm:$0xff] }
 0x197   : > { %v1671_v30 = vsel %vm1607_vm5, %v1575_v49, %v1639_v10  ;;  %v1675_v58 = vsel %vm1611_vm6, %v1579_v1, %v1643_v41  ;;  %v1241_v9 = vadd.f32 %v3583_v50, %v3124_v22  ;;  %v1245_v59 = vadd.f32 %v1213_v12, %v1179_v31  ;;  %v3593_v10 = vld [vmem:[#allocation112_spill] sm:$0xff]  ;;  %v3597_v50 = vld [vmem:[#allocation29_spill] sm:$0xff] }
 0x198   : > { %v1667_v27 = vsel %vm1603_vm7, %v1571_v18, %v1635_v39  ;;  %1703 = vst.msk [vmem:[%s2897_s10 + $0x80] sm:$0xff] %vm706_vm2, %v1671_v30  ;;  %v3230_v7 = vadd.f32 %v3584_v63, %v946_v19  ;;  %v1249_v43 = vadd.f32 %v3585_v44, %v1183_v37  ;;  %v1275_v45 = vmul.f32 %v3022_v0, %v1109_v26  ;;  %v3588_v26 = vld [vmem:[#allocation113_spill] sm:$0xff]  ;;  %v1100_v63 = vld [vmem:[#allocation2 + $0xfa] sm:$0xff] }
 0x199   : > { %1699 = vst.msk [vmem:[%s2897_s10 + $0x60] sm:$0xff] %vm706_vm2, %v1667_v27  ;;  %v1311_v2 = vadd.f32 %v3586_v4, %v1245_v59  ;;  %v1389_v13 = vmul.f32 %v3034_v23, %v1347_v54  ;;  %v1451_v22 = vmul.f32 %v3048_v52, %v1347_v54  ;;  %v1056_v34 = vadd.f32 %v3587_v61, %v3136_v24  ;;  %v1326_v24 = vld [vmem:[#allocation2 + $0x6c] sm:$0xff] }
 0x19a   : > { %1707 = vst.msk [vmem:[%s2897_s10 + $0xa0] sm:$0xff] %vm706_vm2, %v1675_v58  ;;  %v1307_v42 = vadd.f32 %v1275_v45, %v1241_v9  ;;  %v1315_v47 = vadd.f32 %v3159_v3, %v1249_v43  ;;  %v1130_v11 = vmul.f32 %v3001_v40, %v1088_v5  ;;  %v1158_v8 = vadd.f32 %v3588_v26, %v3139_v17  ;;  %v3594_v39 = vld [vmem:[#allocation97_spill] sm:$0xff]  ;;  %v3596_v58 = vld [vmem:[#allocation98_spill] sm:$0xff]  ;;  %v3599_v43 = vld [vmem:[#allocation123_spill] sm:$0xff] }
 0x19b   : > { %v1417_v57 = vadd.f32 %v3589_v28, %v1311_v2  ;;  %v1192_v19 = vmul.f32 %v3013_v53, %v1088_v5  ;;  %v1220_v49 = vadd.f32 %v3590_v25, %v3145_v48  ;;  %v1254_v1 = vmul.f32 %v3022_v0, %v1088_v5  ;;  %v3595_v48 = vld [vmem:[#allocation28_spill] sm:$0xff]  ;;  %v3598_v59 = vld [vmem:[#allocation21_spill] sm:$0xff] }
 0x19c   : > { %v3253_v21 = vadd.f32 %v3591_v36, %v1008_v51  ;;  %v1413_v3 = vadd.f32 %v3592_v56, %v1307_v42  ;;  %v1421_v18 = vadd.f32 %v1389_v13, %v1315_v47  ;;  %v1162_v20 = vadd.f32 %v1130_v11, %v1056_v34  ;;  %v3600_v13 = vld [vmem:[#allocation115_spill] sm:$0xff]  ;;  %v3601_v61 = vld [vmem:[#allocation116_spill] sm:$0xff] }
 0x19d   : > { %v1483_v16 = vadd.f32 %v1451_v22, %v1417_v57  ;;  %v1513_v17 = vmul.f32 %v3040_v38, %v1347_v54  ;;  %v1224_v31 = vadd.f32 %v1192_v19, %v1158_v8  ;;  %v1286_v12 = vadd.f32 %v1254_v1, %v1220_v49  ;;  %v3603_v1 = vld [vmem:[#allocation32_spill] sm:$0xff] }
 0x19e   : > { %v1479_v41 = vadd.f32 %v3593_v10, %v1413_v3  ;;  %v1487_v35 = vadd.f32 %v3594_v39, %v1421_v18  ;;  %v1228_v37 = vadd.f32 %v3595_v48, %v1162_v20  ;;  %v1368_v30 = vmul.f32 %v3034_v23, %v1326_v24  ;;  %v3604_v18 = vld [vmem:[#allocation121_spill] sm:$0xff] }
 0x19f   : > { %v1549_v51 = vadd.f32 %v3596_v58, %v1483_v16  ;;  %v1290_v9 = vadd.f32 %v3597_v50, %v1224_v31  ;;  %v1392_v5 = vadd.f32 %v3598_v59, %v1286_v12  ;;  %v1430_v27 = vmul.f32 %v3048_v52, %v1326_v24 }
 0x1a0   : > { %v1545_v54 = vadd.f32 %v1513_v17, %v1479_v41  ;;  %v1553_v44 = vadd.f32 %v3166_v46, %v1487_v35  ;;  %v1294_v45 = vadd.f32 %v3599_v43, %v1228_v37  ;;  %v1492_v4 = vmul.f32 %v3040_v38, %v1326_v24  ;;  %v3605_v17 = vld [vmem:[#allocation126_spill] sm:$0xff]  ;;  %v3607_v37 = vld [vmem:[#allocation73_spill] sm:$0xff] }
 0x1a1   : > { %v1585_v2 = vadd.f32 %v2863_v55, %v1549_v51  ;;  %v1396_v22 = vadd.f32 %v3600_v13, %v1290_v9  ;;  %v1458_v34 = vadd.f32 %v3601_v61, %v1392_v5  ;;  %v1068_v42 = vadd.f32 %v2901_v6, %v3172_v33  ;;  %v3602_v6 = vld [vmem:[#allocation31_spill] sm:$0xff]  ;;  %v3606_v35 = vld [vmem:[#allocation122_spill] sm:$0xff] }
 0x1a2   : > { %v1581_v47 = vadd.f32 %v2863_v55, %v1545_v54  ;;  %v1589_v11 = vadd.f32 %v2863_v55, %v1553_v44  ;;  %v1400_v26 = vadd.f32 %v1368_v30, %v1294_v45  ;;  %v1142_v46 = vmul.f32 %v3001_v40, %v1100_v63  ;;  %v1338_v41 = vld [vmem:[#allocation2 + $0xfc] sm:$0xff] }
 0x1a3   : > { %vm1617_vm8 = vcmp.gt.f32.partialorder %v1585_v2, 0.0  ;;  %v1649_v8 = vmul.f32 0.01, %v1585_v2  ;;  %v1462_v28 = vadd.f32 %v1430_v27, %v1396_v22  ;;  %v1524_v57 = vadd.f32 %v1492_v4, %v1458_v34  ;;  %v3608_v43 = vld [vmem:[#allocation74_spill] sm:$0xff] }
 0x1a4   : > { %vm1613_vm9 = vcmp.gt.f32.partialorder %v1581_v47, 0.0  ;;  %vm1621_vm10 = vcmp.gt.f32.partialorder %v1589_v11, 0.0  ;;  %v1645_v19 = vmul.f32 0.01, %v1581_v47  ;;  %v1653_v25 = vmul.f32 0.01, %v1589_v11 }
 0x1a5   : > { %v1681_v49 = vsel %vm1617_vm8, %v1585_v2, %v1649_v8  ;;  %v1466_v33 = vadd.f32 %v3602_v6, %v1400_v26  ;;  %v1528_v24 = vadd.f32 %v3603_v1, %v1462_v28  ;;  %v1560_v36 = vadd.f32 %v2863_v55, %v1524_v57  ;;  %v3609_v4 = vld [vmem:[#allocation30_spill] sm:$0xff]  ;;  %v3611_v26 = vld [vmem:[#allocation124_spill] sm:$0xff]  ;;  %v3612_v8 = vld [vmem:[#allocation125_spill] sm:$0xff] }
 0x1a6   : > { %v1677_v56 = vsel %vm1613_vm9, %v1581_v47, %v1645_v19  ;;  %v1685_v3 = vsel %vm1621_vm10, %v1589_v11, %v1653_v25  ;;  %1713 = vst.msk [vmem:[%s2897_s10 + $0xd0] sm:$0xff] %vm706_vm2, %v1681_v49  ;;  %v1170_v20 = vadd.f32 %v3604_v18, %v3177_v15  ;;  %v1174_v16 = vadd.f32 %v1142_v46, %v1068_v42  ;;  %v3610_v42 = vld [vmem:[#allocation127_spill] sm:$0xff]  ;;  %v1118_v11 = vld [vmem:[#allocation2 + $0x1d2] sm:$0xff]  ;;  %v3613_v57 = vld [vmem:[#allocation76_spill] sm:$0xff] }
 0x1a7   : > { %1709 = vst.msk [vmem:[%s2897_s10 + $0xb0] sm:$0xff] %vm706_vm2, %v1677_v56  ;;  %v1532_v31 = vadd.f32 %v3605_v17, %v1466_v33  ;;  %v1564_v12 = vadd.f32 %v2863_v55, %v1528_v24  ;;  %vm1592_vm11 = vcmp.gt.f32.partialorder %v1560_v36, 0.0  ;;  %v1624_v10 = vmul.f32 0.01, %v1560_v36  ;;  %v1348_v49 = vld [vmem:[#allocation2 + $0x174] sm:$0xff]  ;;  %v1961_v6 = vld [vmem:[#allocation2 + $0x144] sm:$0xff] }
 0x1a8   : > { %1717 = vst.msk [vmem:[%s2897_s10 + $0xf0] sm:$0xff] %vm706_vm2, %v1685_v3  ;;  %v1204_v39 = vmul.f32 %v3013_v53, %v1100_v63  ;;  %v1232_v48 = vadd.f32 %v3606_v35, %v3208_v62  ;;  %v1240_v15 = vadd.f32 %v3607_v37, %v1174_v16  ;;  %v1266_v30 = vmul.f32 %v3022_v0, %v1100_v63  ;;  %v1110_v62 = vld [vmem:[#allocation2 + $0x172] sm:$0xff] }
 0x1a9   : > { %v1568_v58 = vadd.f32 %v2863_v55, %v1532_v31  ;;  %vm1596_vm12 = vcmp.gt.f32.partialorder %v1564_v12, 0.0  ;;  %v1628_v51 = vmul.f32 0.01, %v1564_v12  ;;  %v1656_v50 = vsel %vm1592_vm11, %v1560_v36, %v1624_v10  ;;  %v3615_v18 = vld [vmem:[#allocation117_spill] sm:$0xff]  ;;  %v3617_v10 = vld [vmem:[#allocation118_spill] sm:$0xff] }
 0x1aa   : > { %1688 = vst.msk [vmem:[%s2897_s10 + $0x8] sm:$0xff] %vm706_vm2, %v1656_v50  ;;  %v1236_v9 = vadd.f32 %v1204_v39, %v1170_v20  ;;  %v1298_v59 = vadd.f32 %v1266_v30, %v1232_v48  ;;  %v1306_v5 = vadd.f32 %v3070_v14, %v1240_v15  ;;  %v1380_v27 = vmul.f32 %v3034_v23, %v1338_v41  ;;  %v3616_v17 = vld [vmem:[#allocation77_spill] sm:$0xff]  ;;  %v3618_v48 = vld [vmem:[#allocation36_spill] sm:$0xff] }
 0x1ab   : > { %vm1600_vm13 = vcmp.gt.f32.partialorder %v1568_v58, 0.0  ;;  %v1632_v54 = vmul.f32 0.01, %v1568_v58  ;;  %v1660_v44 = vsel %vm1596_vm12, %v1564_v12, %v1628_v51  ;;  %v1442_v63 = vmul.f32 %v3048_v52, %v1338_v41  ;;  %v1356_v39 = vld [vmem:[#allocation2 + $0x1d4] sm:$0xff] }
 0x1ac   : > { %1692 = vst.msk [vmem:[%s2897_s10 + $0x28] sm:$0xff] %vm706_vm2, %v1660_v44  ;;  %v1302_v45 = vadd.f32 %v3608_v43, %v1236_v9  ;;  %v1404_v2 = vadd.f32 %v3609_v4, %v1298_v59  ;;  %v1412_v13 = vadd.f32 %v1380_v27, %v1306_v5  ;;  %v1504_v22 = vmul.f32 %v3040_v38, %v1338_v41  ;;  %v3621_v43 = vld [vmem:[#allocation120_spill] sm:$0xff]  ;;  %v1962_v4 = vld [vmem:[%s3364_s4] ss:$0 sm:$0xff] }
 0x1ad   : > { %v1664_v61 = vsel %vm1600_vm13, %v1568_v58, %v1632_v54  ;;  %v1078_v14 = vadd.f32 %v3149_v60, %v3230_v7  ;;  %v1152_v34 = vmul.f32 %v3001_v40, %v1110_v62  ;;  %v1180_v47 = vadd.f32 %v3610_v42, %v3253_v21  ;;  %v3614_v40 = vld [vmem:[#allocation128_spill] sm:$0xff]  ;;  %v3619_v58 = vld [vmem:[#allocation129_spill] sm:$0xff] }
 0x1ae   : > { %1696 = vst.msk [vmem:[%s2897_s10 + $0x48] sm:$0xff] %vm706_vm2, %v1664_v61  ;;  %v1408_v46 = vadd.f32 %v3611_v26, %v1302_v45  ;;  %v1470_v28 = vadd.f32 %v3612_v8, %v1404_v2  ;;  %v1478_v19 = vadd.f32 %v3613_v57, %v1412_v13  ;;  %v1214_v25 = vmul.f32 %v3013_v53, %v1110_v62 }
 0x1af   : > { %v1448_v60 = vmul.f32 %v1961_v6, %v3048_v52  ;;  %v1184_v7 = vadd.f32 %v1152_v34, %v1078_v14  ;;  %v1242_v33 = vadd.f32 %v3614_v40, %v3223_v29  ;;  %v1276_v21 = vmul.f32 %v3022_v0, %v1110_v62 }
 0x1b0   : > { %v1474_v1 = vadd.f32 %v1442_v63, %v1408_v46  ;;  %v1536_v24 = vadd.f32 %v1504_v22, %v1470_v28  ;;  %v1544_v36 = vadd.f32 %v3082_v32, %v1478_v19  ;;  %v1246_v56 = vadd.f32 %v1214_v25, %v1180_v47 }
 0x1b1   : > { %v1284_v3 = vmul.f32 %v3022_v0, %v1118_v11  ;;  %v1250_v20 = vadd.f32 %v3615_v18, %v1184_v7  ;;  %v1308_v53 = vadd.f32 %v1276_v21, %v1242_v33  ;;  %v1390_v16 = vmul.f32 %v3034_v23, %v1348_v49 }
 0x1b2   : > { %v1540_v31 = vadd.f32 %v3616_v17, %v1474_v1  ;;  %v1572_v12 = vadd.f32 %v2863_v55, %v1536_v24  ;;  %v1580_v29 = vadd.f32 %v2863_v55, %v1544_v36  ;;  %v1312_v41 = vadd.f32 %v3617_v10, %v1246_v56 }
 0x1b3   : > { %v1316_v35 = vadd.f32 %v1284_v3, %v1250_v20  ;;  %v1414_v32 = vadd.f32 %v3618_v48, %v1308_v53  ;;  %v1452_v0 = vmul.f32 %v3048_v52, %v1348_v49  ;;  %v1514_v37 = vmul.f32 %v3040_v38, %v1348_v49 }
 0x1b4   : > { %v1576_v15 = vadd.f32 %v2863_v55, %v1540_v31  ;;  %vm1604_vm14 = vcmp.gt.f32.partialorder %v1572_v12, 0.0  ;;  %vm1612_vm15 = vcmp.gt.f32.partialorder %v1580_v29, 0.0  ;;  %v1636_v23 = vmul.f32 0.01, %v1572_v12  ;;  %v3620_v55 = vld [vmem:[#allocation119_spill] sm:$0xff] }
 0x1b5   : > { %v1644_v30 = vmul.f32 0.01, %v1580_v29  ;;  %v1418_v51 = vadd.f32 %v3619_v58, %v1312_v41  ;;  %v1422_v50 = vadd.f32 %v1390_v16, %v1316_v35  ;;  %v1480_v9 = vadd.f32 %v1448_v60, %v1414_v32 }
 0x1b6   : > { %v1522_v59 = vmul.f32 %v3040_v38, %v1356_v39  ;;  %vm1608_vm0 = vcmp.gt.f32.partialorder %v1576_v15, 0.0  ;;  %v1640_v5 = vmul.f32 0.01, %v1576_v15  ;;  %v1668_v27 = vsel %vm1604_vm14, %v1572_v12, %v1636_v23 }
 0x1b7   : > { %v1676_v52 = vsel %vm1612_vm15, %v1580_v29, %v1644_v30  ;;  %1700 = vst.msk [vmem:[%s2897_s10 + $0x68] sm:$0xff] %vm706_vm2, %v1668_v27  ;;  %v1484_v62 = vadd.f32 %v1452_v0, %v1418_v51  ;;  %v1488_v54 = vadd.f32 %v3620_v55, %v1422_v50  ;;  %v1546_v44 = vadd.f32 %v1514_v37, %v1480_v9 }
 0x1b8   : > { %v1672_v63 = vsel %vm1608_vm0, %v1576_v15, %v1640_v5  ;;  %1708 = vst.msk [vmem:[%s2897_s10 + $0xa8] sm:$0xff] %vm706_vm2, %v1676_v52 }
 0x1b9   : > { %1704 = vst.msk [vmem:[%s2897_s10 + $0x88] sm:$0xff] %vm706_vm2, %v1672_v63  ;;  %v1550_v45 = vadd.f32 %v3621_v43, %v1484_v62  ;;  %v1554_v38 = vadd.f32 %v1522_v59, %v1488_v54  ;;  %v1582_v2 = vadd.f32 %v1962_v4, %v1546_v44 }
 0x1bb   : > { %v1586_v13 = vadd.f32 %v1962_v4, %v1550_v45  ;;  %v1590_v22 = vadd.f32 %v1962_v4, %v1554_v38  ;;  %vm1614_vm1 = vcmp.gt.f32.partialorder %v1582_v2, 0.0  ;;  %v1646_v61 = vmul.f32 0.01, %v1582_v2 }
 0x1bd   : > { %vm1618_vm3 = vcmp.gt.f32.partialorder %v1586_v13, 0.0  ;;  %vm1622_vm4 = vcmp.gt.f32.partialorder %v1590_v22, 0.0  ;;  %v1650_v14 = vmul.f32 0.01, %v1586_v13  ;;  %v1654_v34 = vmul.f32 0.01, %v1590_v22 }
 0x1be   : > { %v1678_v42 = vsel %vm1614_vm1, %v1582_v2, %v1646_v61 }
 0x1bf   : > { %v1682_v47 = vsel %vm1618_vm3, %v1586_v13, %v1650_v14  ;;  %v1686_v11 = vsel %vm1622_vm4, %v1590_v22, %v1654_v34  ;;  %1710 = vst.msk [vmem:[%s2897_s10 + $0xb8] sm:$0xff] %vm706_vm2, %v1678_v42 }
 0x1c0   : > { %1714 = vst.msk [vmem:[%s2897_s10 + $0xd8] sm:$0xff] %vm706_vm2, %v1682_v47 }
 0x1c1   : > { %1718 = vst.msk [vmem:[%s2897_s10 + $0xf8] sm:$0xff] %vm706_vm2, %v1686_v11 }
 0x1c2 PF: > { %s15_s20 = sadd.s32 1, %s1985_s20   ;;  %s3622_s18 = smov %s1981_s19 }
 0x1c3   : > { %p12_p5 = scmp.ge.s32.totalorder %s15_s20, 4   ;;  %s3623_s19 = smov %s3625_s21 }
 0x1c5   :  { %14 = sbr.rel (!%p12_p5) target bundleno = 2 (0x2), region = 74 }

</bundles_post_ra>
